<compile_context>
chip_gen: v7x
topology: tpu7x:2x2x1
jax: 0.10.0
libtpu: 0.0.40
codegen_flags: <defaults>
</compile_context>

<pallas_src>
import functools
import math

import jax
import jax.numpy as jnp
from jax import lax
from jax.experimental import pallas as pl
from jax.experimental.pallas import tpu as pltpu

# dtype used for MXU matmul operands (accumulation is always f32).
MXU_DTYPE = jnp.bfloat16


# ------------------------------ in-kernel helpers ---------------------------

def _layernorm(x, g, b, eps=1e-5):
    # PyTorch LayerNorm: biased variance, eps added inside rsqrt.  f32 math.
    mu = jnp.mean(x, axis=-1, keepdims=True)
    var = jnp.mean((x - mu) ** 2, axis=-1, keepdims=True)
    return (x - mu) * lax.rsqrt(var + eps) * g + b


# ---------------------------------- kernels ---------------------------------

def _stem_kernel(x_ref, gin_ref, bin_ref, wc_ref, bc_ref, gc_ref, bcn_ref,
                 pe_ref, o_ref):
    # One batch element per grid step.
    # inlayernorm -> inconv (1x1 conv == per-timestep linear) -> convlayernorm
    # -> + sinusoidal positional encoding (positions 1..T).
    x = x_ref[0]                                                # (T, C_in) f32
    xn = _layernorm(x, gin_ref[...], bin_ref[...])
    h = jnp.dot(xn.astype(MXU_DTYPE), wc_ref[...],
                preferred_element_type=jnp.float32) + bc_ref[...]
    h = _layernorm(h, gc_ref[...], bcn_ref[...])
    o_ref[0] = h + pe_ref[...]


def _layer_kernel(x_ref, wqkv_ref, bqkv_ref, wfc_ref, bfc_ref,
                  ln1g_ref, ln1b_ref, w1_ref, b1_ref, w2_ref, b2_ref,
                  ln2g_ref, ln2b_ref, o_ref, *, n_head, d_k, d_v):
    # One full post-LN encoder layer for one batch element.
    x = x_ref[0]                                                # (T, D) f32
    t, d_model = x.shape

    # ---- fused Q|K|V projection (1/sqrt(d_k) already folded into Q slice) --
    qkv = jnp.dot(x.astype(MXU_DTYPE), wqkv_ref[...],
                  preferred_element_type=jnp.float32) + bqkv_ref[...]
    q_off, k_off, v_off = 0, n_head * d_k, 2 * n_head * d_k

    wfc = wfc_ref[...]                                          # (H*dv, D) bf16

    # ---- per-head scaled-dot-product attention, fused with the fc proj ----
    # attn_out @ wfc == sum_h out_h @ wfc[h*dv:(h+1)*dv, :], so head outputs
    # never need to be concatenated / permuted.
    acc = None
    for hh in range(n_head):
        q = qkv[:, q_off + hh * d_k: q_off + (hh + 1) * d_k]    # (T, dk)
        k = qkv[:, k_off + hh * d_k: k_off + (hh + 1) * d_k]    # (T, dk)
        v = qkv[:, v_off + hh * d_v: v_off + (hh + 1) * d_v]    # (T, dv)
        # s = q @ k^T  (contraction on last dim of both operands)
        s = lax.dot_general(q, k, (((1,), (1,)), ((), ())),
                            preferred_element_type=jnp.float32)  # (T, T)
        m = jnp.max(s, axis=-1, keepdims=True)
        p = jnp.exp(s - m)
        p = p * pl.reciprocal(jnp.sum(p, axis=-1, keepdims=True), approx=True)
        out_h = jnp.dot(p, v, preferred_element_type=jnp.float32)  # (T, dv)
        contrib = jnp.dot(out_h.astype(MXU_DTYPE),
                          wfc[hh * d_v:(hh + 1) * d_v, :],
                          preferred_element_type=jnp.float32)       # (T, D)
        acc = contrib if acc is None else acc + contrib

    # ---- fc bias + residual + LayerNorm1 (post-LN) ----
    h1 = _layernorm(acc + bfc_ref[...] + x, ln1g_ref[...], ln1b_ref[...])

    # ---- position-wise FFN (w1 -> ReLU -> w2) + residual + LayerNorm2 ----
    f = jnp.dot(h1.astype(MXU_DTYPE), w1_ref[...],
                preferred_element_type=jnp.float32) + b1_ref[...]
    f = jnp.maximum(f, 0.0)
    h2 = jnp.dot(f.astype(MXU_DTYPE), w2_ref[...],
                 preferred_element_type=jnp.float32) + b2_ref[...] + h1
    o_ref[0] = _layernorm(h2, ln2g_ref[...], ln2b_ref[...])


def _head_kernel(x_ref, g_ref, b_ref, w_ref, o_ref):
    # outlayernorm -> outlinear (no bias) -> log_softmax, last timestep only.
    xn = _layernorm(x_ref[...], g_ref[...], b_ref[...])         # (B, D)
    logits = jnp.dot(xn.astype(MXU_DTYPE), w_ref[...],
                     preferred_element_type=jnp.float32)        # (B, ncls)
    m = jnp.max(logits, axis=-1, keepdims=True)
    z = logits - m
    lse = jnp.log(jnp.sum(jnp.exp(z), axis=-1, keepdims=True))
    o_ref[...] = z - lse


# ------------------------------ pallas wrappers ------------------------------

def stem_forward(x, p):
    B, T, C = x.shape
    D = p['conv_w'].shape[1]
    full = lambda b: (0, 0)
    return pl.pallas_call(
        _stem_kernel,
        out_shape=jax.ShapeDtypeStruct((B, T, D), jnp.float32),
        grid=(B,),
        in_specs=[
            pl.BlockSpec((1, T, C), lambda b: (b, 0, 0)),
            pl.BlockSpec((1, C), full), pl.BlockSpec((1, C), full),
            pl.BlockSpec((C, D), full), pl.BlockSpec((1, D), full),
            pl.BlockSpec((1, D), full), pl.BlockSpec((1, D), full),
            pl.BlockSpec((T, D), full),
        ],
        out_specs=pl.BlockSpec((1, T, D), lambda b: (b, 0, 0)),
        compiler_params=pltpu.CompilerParams(dimension_semantics=("parallel",)),
    )(x, p['ln_in_g'], p['ln_in_b'], p['conv_w'], p['conv_b'],
      p['ln_conv_g'], p['ln_conv_b'], p['pos_enc'])


def layer_forward(h, lp, *, n_head, d_k, d_v):
    B, T, D = h.shape
    n_qkv = 2 * n_head * d_k + n_head * d_v
    d_inner = lp['w1'].shape[1]
    kern = functools.partial(_layer_kernel, n_head=n_head, d_k=d_k, d_v=d_v)
    full = lambda b: (0, 0)
    return pl.pallas_call(
        kern,
        out_shape=jax.ShapeDtypeStruct((B, T, D), jnp.float32),
        grid=(B,),
        in_specs=[
            pl.BlockSpec((1, T, D), lambda b: (b, 0, 0)),
            pl.BlockSpec((D, n_qkv), full), pl.BlockSpec((1, n_qkv), full),
            pl.BlockSpec((n_head * d_v, D), full), pl.BlockSpec((1, D), full),
            pl.BlockSpec((1, D), full), pl.BlockSpec((1, D), full),
            pl.BlockSpec((D, d_inner), full), pl.BlockSpec((1, d_inner), full),
            pl.BlockSpec((d_inner, D), full), pl.BlockSpec((1, D), full),
            pl.BlockSpec((1, D), full), pl.BlockSpec((1, D), full),
        ],
        out_specs=pl.BlockSpec((1, T, D), lambda b: (b, 0, 0)),
        compiler_params=pltpu.CompilerParams(dimension_semantics=("parallel",)),
    )(h, lp['w_qkv'], lp['b_qkv'], lp['w_fc'], lp['b_fc'],
      lp['ln1_g'], lp['ln1_b'], lp['w1'], lp['b1'], lp['w2'], lp['b2'],
      lp['ln2_g'], lp['ln2_b'])


def head_forward(h_last, p):
    B, D = h_last.shape
    ncls = p['w_out'].shape[1]
    full = lambda i: (0, 0)
    return pl.pallas_call(
        _head_kernel,
        out_shape=jax.ShapeDtypeStruct((B, ncls), jnp.float32),
        grid=(1,),
        in_specs=[pl.BlockSpec((B, D), full), pl.BlockSpec((1, D), full),
                  pl.BlockSpec((1, D), full), pl.BlockSpec((D, ncls), full)],
        out_specs=pl.BlockSpec((B, ncls), full),
    )(h_last, p['ln_out_g'], p['ln_out_b'], p['w_out'])


# -------------------------- parameters / pos-enc ----------------------------

def sinusoid_pos_encoding(seq_len, d_model):
    # Matches get_sinusoid_encoding_table for positions 1..seq_len
    # (position 0 is the zero padding row, never used since src_pos = 1..T).
    pos = jnp.arange(1, seq_len + 1, dtype=jnp.float32)[:, None]       # (T, 1)
    j = jnp.arange(d_model)
    exponent = (2 * (j // 2)).astype(jnp.float32) / float(d_model)
    angle = pos / jnp.power(10000.0, exponent)[None, :]                # (T, D)
    pe = jnp.where(j % 2 == 0, jnp.sin(angle), jnp.cos(angle))
    return pe.astype(jnp.float32)


def init_params(key, *, input_dim, d_model, d_inner, n_layers, n_head, d_k,
                d_v, num_classes, seq_len):
    # Parameters in the original (per-PyTorch-module) layout, f32.
    def dense(k, shape, scale=0.05):
        return (scale * jax.random.normal(k, shape)).astype(jnp.float32)

    keys = jax.random.split(key, 2 + n_layers)
    params = {
        'ln_in_g': jnp.ones((input_dim,), jnp.float32),
        'ln_in_b': jnp.zeros((input_dim,), jnp.float32),
        # inconv: Conv1d(in, d_model, 1) -> (input_dim, d_model) matmul weight
        'conv_w': dense(keys[0], (input_dim, d_model)),
        'conv_b': jnp.zeros((d_model,), jnp.float32),
        'ln_conv_g': jnp.ones((d_model,), jnp.float32),
        'ln_conv_b': jnp.zeros((d_model,), jnp.float32),
        'ln_out_g': jnp.ones((d_model,), jnp.float32),
        'ln_out_b': jnp.zeros((d_model,), jnp.float32),
        'w_out': dense(keys[1], (d_model, num_classes)),   # outlinear, no bias
        'pos_enc': sinusoid_pos_encoding(seq_len, d_model),
        'layers': [],
    }
    for li in range(n_layers):
        lk = jax.random.split(keys[2 + li], 6)
        params['layers'].append({
            'wq': dense(lk[0], (d_model, n_head * d_k)),
            'bq': jnp.zeros((n_head * d_k,), jnp.float32),
            'wk': dense(lk[1], (d_model, n_head * d_k)),
            'bk': jnp.zeros((n_head * d_k,), jnp.float32),
            'wv': dense(lk[2], (d_model, n_head * d_v)),
            'bv': jnp.zeros((n_head * d_v,), jnp.float32),
            'wfc': dense(lk[3], (n_head * d_v, d_model)),
            'bfc': jnp.zeros((d_model,), jnp.float32),
            'ln1_g': jnp.ones((d_model,), jnp.float32),
            'ln1_b': jnp.zeros((d_model,), jnp.float32),
            # PositionwiseFeedForward: two 1x1 Conv1d == two Linears
            'w1': dense(lk[4], (d_model, d_inner)),
            'b1': jnp.zeros((d_inner,), jnp.float32),
            'w2': dense(lk[5], (d_inner, d_model)),
            'b2': jnp.zeros((d_model,), jnp.float32),
            'ln2_g': jnp.ones((d_model,), jnp.float32),
            'ln2_b': jnp.zeros((d_model,), jnp.float32),
        })
    return params


def fuse_params(params, *, d_k):
    # One-time (trace/host-side) preparation for the fused kernels:
    #  * fold 1/sqrt(d_k) temperature into the Q projection,
    #  * concatenate wq|wk|wv into a single lane-dense weight,
    #  * cast matmul weights to bf16 (MXU operands), keep LN params / biases f32,
    #  * reshape 1-D vectors to (1, N) for 2-D BlockSpecs.
    inv_temp = 1.0 / math.sqrt(d_k)  # temperature = np.power(d_k, 0.5)

    def row(v):
        return v.reshape(1, -1).astype(jnp.float32)

    fused = {
        'ln_in_g': row(params['ln_in_g']), 'ln_in_b': row(params['ln_in_b']),
        'conv_w': params['conv_w'].astype(MXU_DTYPE),
        'conv_b': row(params['conv_b']),
        'ln_conv_g': row(params['ln_conv_g']), 'ln_conv_b': row(params['ln_conv_b']),
        'ln_out_g': row(params['ln_out_g']), 'ln_out_b': row(params['ln_out_b']),
        'w_out': params['w_out'].astype(MXU_DTYPE),
        'pos_enc': params['pos_enc'],
        'layers': [],
    }
    for lp in params['layers']:
        w_qkv = jnp.concatenate(
            [lp['wq'] * inv_temp, lp['wk'], lp['wv']], axis=1)
        b_qkv = jnp.concatenate(
            [lp['bq'] * inv_temp, lp['bk'], lp['bv']], axis=0)
        fused['layers'].append({
            'w_qkv': w_qkv.astype(MXU_DTYPE),
            'b_qkv': row(b_qkv),
            'w_fc': lp['wfc'].astype(MXU_DTYPE),
            'b_fc': row(lp['bfc']),
            'ln1_g': row(lp['ln1_g']), 'ln1_b': row(lp['ln1_b']),
            'w1': lp['w1'].astype(MXU_DTYPE), 'b1': row(lp['b1']),
            'w2': lp['w2'].astype(MXU_DTYPE), 'b2': row(lp['b2']),
            'ln2_g': row(lp['ln2_g']), 'ln2_b': row(lp['ln2_b']),
        })
    return fused


# -------------------------------- forward pass -------------------------------

def transformer_forward(x, fused_params, *, n_head, d_k, d_v):
    # x: (B, T, C_in) f32
    h = stem_forward(x, fused_params)                         # (B, T, D)
    for lp in fused_params['layers']:
        h = layer_forward(h, lp, n_head=n_head, d_k=d_k, d_v=d_v)
    # Per-timestep head: slice the last timestep BEFORE LN / classifier.
    h_last = h[:, -1, :]                                      # (B, D)
    return head_forward(h_last, fused_params)                 # (B, nclasses)

# TODO(synk): dropout layers are identity in eval mode and are not modeled.


# ------------------------------------ main -----------------------------------

if __name__ == "__main__":
    # Small, module-consistent shapes
    B, T = 2, 8
    input_dim = 13
    d_model = d_word_vec = 64
    d_inner = 128
    n_layers = 2
    n_head = 4
    d_k = d_v = 16
    num_classes = 6

    key = jax.random.PRNGKey(0)
    kx, kp = jax.random.split(key)
    x = jax.random.normal(kx, (B, T, input_dim), dtype=jnp.float32)

    params = init_params(kp, input_dim=input_dim, d_model=d_model,
                         d_inner=d_inner, n_layers=n_layers, n_head=n_head,
                         d_k=d_k, d_v=d_v, num_classes=num_classes, seq_len=T)
    fused = fuse_params(params, d_k=d_k)

    fwd = jax.jit(functools.partial(transformer_forward,
                                    n_head=n_head, d_k=d_k, d_v=d_v))
    logprobs = fwd(x, fused)
    jax.block_until_ready(logprobs)

    assert logprobs.shape == (B, num_classes)
    assert bool(jnp.all(jnp.isfinite(logprobs)))
    # rows of log_softmax should exp-sum to ~1
    assert bool(jnp.allclose(jnp.sum(jnp.exp(logprobs), axis=-1), 1.0, atol=1e-4))
    print("KERNEL_OK")
</pallas_src>

<mosaic_0001>
module attributes {stable_mosaic.version = 11 : i64} {
  func.func @_stem_kernel(%arg0: i32, %arg1: memref<1x8x13xf32, #tpu.memory_space<vmem>>, %arg2: memref<1x13xf32, #tpu.memory_space<vmem>>, %arg3: memref<1x13xf32, #tpu.memory_space<vmem>>, %arg4: memref<13x64xbf16, #tpu.memory_space<vmem>>, %arg5: memref<1x64xf32, #tpu.memory_space<vmem>>, %arg6: memref<1x64xf32, #tpu.memory_space<vmem>>, %arg7: memref<1x64xf32, #tpu.memory_space<vmem>>, %arg8: memref<8x64xf32, #tpu.memory_space<vmem>>, %arg9: memref<1x8x64xf32, #tpu.memory_space<vmem>>) attributes {dimension_semantics = [#tpu.dimension_semantics<parallel>], iteration_bounds = array<i64: 2>, scalar_prefetch = 0 : i64, scratch_operands = 0 : i64, tpu.core_type = #tpu.core_type<tc>, window_params = [{transform_indices = @transform_0, window_bounds = array<i64: 1, 8, 13>}, {pipeline_mode = #tpu.pipeline_mode<synchronous>, transform_indices = @transform_1, window_bounds = array<i64: 1, 13>}, {pipeline_mode = #tpu.pipeline_mode<synchronous>, transform_indices = @transform_2, window_bounds = array<i64: 1, 13>}, {pipeline_mode = #tpu.pipeline_mode<synchronous>, transform_indices = @transform_3, window_bounds = array<i64: 13, 64>}, {pipeline_mode = #tpu.pipeline_mode<synchronous>, transform_indices = @transform_4, window_bounds = array<i64: 1, 64>}, {pipeline_mode = #tpu.pipeline_mode<synchronous>, transform_indices = @transform_5, window_bounds = array<i64: 1, 64>}, {pipeline_mode = #tpu.pipeline_mode<synchronous>, transform_indices = @transform_6, window_bounds = array<i64: 1, 64>}, {pipeline_mode = #tpu.pipeline_mode<synchronous>, transform_indices = @transform_7, window_bounds = array<i64: 8, 64>}, {transform_indices = @transform_8, window_bounds = array<i64: 1, 8, 64>}]} {
    %c0 = arith.constant 0 : index
    %c0_0 = arith.constant 0 : index
    %c0_1 = arith.constant 0 : index
    %0 = vector.load %arg1[%c0, %c0_0, %c0_1] : memref<1x8x13xf32, #tpu.memory_space<vmem>>, vector<1x8x13xf32>
    %1 = vector.shape_cast %0 : vector<1x8x13xf32> to vector<8x13xf32>
    %c0_2 = arith.constant 0 : index
    %c0_3 = arith.constant 0 : index
    %2 = vector.load %arg2[%c0_2, %c0_3] : memref<1x13xf32, #tpu.memory_space<vmem>>, vector<1x13xf32>
    %c0_4 = arith.constant 0 : index
    %c0_5 = arith.constant 0 : index
    %3 = vector.load %arg3[%c0_4, %c0_5] : memref<1x13xf32, #tpu.memory_space<vmem>>, vector<1x13xf32>
    %cst = arith.constant dense<0.000000e+00> : vector<8xf32>
    %4 = vector.multi_reduction <add>, %1, %cst [1] : vector<8x13xf32> to vector<8xf32>
    %5 = vector.shape_cast %4 : vector<8xf32> to vector<8x1xf32>
    %cst_6 = arith.constant 1.300000e+01 : f32
    %6 = vector.broadcast %cst_6 : f32 to vector<8x1xf32>
    %7 = arith.divf %5, %6 : vector<8x1xf32>
    %8 = vector.broadcast %7 : vector<8x1xf32> to vector<8x13xf32>
    %9 = arith.subf %1, %8 : vector<8x13xf32>
    %10 = arith.mulf %9, %9 : vector<8x13xf32>
    %cst_7 = arith.constant dense<0.000000e+00> : vector<8xf32>
    %11 = vector.multi_reduction <add>, %10, %cst_7 [1] : vector<8x13xf32> to vector<8xf32>
    %12 = vector.shape_cast %11 : vector<8xf32> to vector<8x1xf32>
    %cst_8 = arith.constant 1.300000e+01 : f32
    %13 = vector.broadcast %cst_8 : f32 to vector<8x1xf32>
    %14 = arith.divf %12, %13 : vector<8x1xf32>
    %15 = vector.broadcast %7 : vector<8x1xf32> to vector<8x13xf32>
    %16 = arith.subf %1, %15 : vector<8x13xf32>
    %cst_9 = arith.constant 9.99999974E-6 : f32
    %17 = vector.broadcast %cst_9 : f32 to vector<8x1xf32>
    %18 = arith.addf %14, %17 : vector<8x1xf32>
    %19 = math.rsqrt %18 : vector<8x1xf32>
    %20 = vector.broadcast %19 : vector<8x1xf32> to vector<8x13xf32>
    %21 = arith.mulf %16, %20 : vector<8x13xf32>
    %22 = vector.broadcast %2 : vector<1x13xf32> to vector<8x13xf32>
    %23 = arith.mulf %21, %22 : vector<8x13xf32>
    %24 = vector.broadcast %3 : vector<1x13xf32> to vector<8x13xf32>
    %25 = arith.addf %23, %24 : vector<8x13xf32>
    %26 = arith.truncf %25 : vector<8x13xf32> to vector<8x13xbf16>
    %c0_10 = arith.constant 0 : index
    %c0_11 = arith.constant 0 : index
    %27 = vector.load %arg4[%c0_10, %c0_11] : memref<13x64xbf16, #tpu.memory_space<vmem>>, vector<13x64xbf16>
    %cst_12 = arith.constant dense<0.000000e+00> : vector<8x64xf32>
    %28 = tpu.matmul %26, %27, %cst_12 {dimension_numbers = #tpu.dot_dimension_numbers<[1], [0], [0], [1], [0, 0, 1, 1], [], []>} : vector<8x13xbf16>, vector<13x64xbf16>, vector<8x64xf32> -> vector<8x64xf32>
    %c0_13 = arith.constant 0 : index
    %c0_14 = arith.constant 0 : index
    %29 = vector.load %arg5[%c0_13, %c0_14] : memref<1x64xf32, #tpu.memory_space<vmem>>, vector<1x64xf32>
    %30 = vector.broadcast %29 : vector<1x64xf32> to vector<8x64xf32>
    %31 = arith.addf %28, %30 : vector<8x64xf32>
    %c0_15 = arith.constant 0 : index
    %c0_16 = arith.constant 0 : index
    %32 = vector.load %arg6[%c0_15, %c0_16] : memref<1x64xf32, #tpu.memory_space<vmem>>, vector<1x64xf32>
    %c0_17 = arith.constant 0 : index
    %c0_18 = arith.constant 0 : index
    %33 = vector.load %arg7[%c0_17, %c0_18] : memref<1x64xf32, #tpu.memory_space<vmem>>, vector<1x64xf32>
    %cst_19 = arith.constant dense<0.000000e+00> : vector<8xf32>
    %34 = vector.multi_reduction <add>, %31, %cst_19 [1] : vector<8x64xf32> to vector<8xf32>
    %35 = vector.shape_cast %34 : vector<8xf32> to vector<8x1xf32>
    %cst_20 = arith.constant 6.400000e+01 : f32
    %36 = vector.broadcast %cst_20 : f32 to vector<8x1xf32>
    %37 = arith.divf %35, %36 : vector<8x1xf32>
    %38 = vector.broadcast %37 : vector<8x1xf32> to vector<8x64xf32>
    %39 = arith.subf %31, %38 : vector<8x64xf32>
    %40 = arith.mulf %39, %39 : vector<8x64xf32>
    %cst_21 = arith.constant dense<0.000000e+00> : vector<8xf32>
    %41 = vector.multi_reduction <add>, %40, %cst_21 [1] : vector<8x64xf32> to vector<8xf32>
    %42 = vector.shape_cast %41 : vector<8xf32> to vector<8x1xf32>
    %cst_22 = arith.constant 6.400000e+01 : f32
    %43 = vector.broadcast %cst_22 : f32 to vector<8x1xf32>
    %44 = arith.divf %42, %43 : vector<8x1xf32>
    %45 = vector.broadcast %37 : vector<8x1xf32> to vector<8x64xf32>
    %46 = arith.subf %31, %45 : vector<8x64xf32>
    %cst_23 = arith.constant 9.99999974E-6 : f32
    %47 = vector.broadcast %cst_23 : f32 to vector<8x1xf32>
    %48 = arith.addf %44, %47 : vector<8x1xf32>
    %49 = math.rsqrt %48 : vector<8x1xf32>
    %50 = vector.broadcast %49 : vector<8x1xf32> to vector<8x64xf32>
    %51 = arith.mulf %46, %50 : vector<8x64xf32>
    %52 = vector.broadcast %32 : vector<1x64xf32> to vector<8x64xf32>
    %53 = arith.mulf %51, %52 : vector<8x64xf32>
    %54 = vector.broadcast %33 : vector<1x64xf32> to vector<8x64xf32>
    %55 = arith.addf %53, %54 : vector<8x64xf32>
    %c0_24 = arith.constant 0 : index
    %c0_25 = arith.constant 0 : index
    %56 = vector.load %arg8[%c0_24, %c0_25] : memref<8x64xf32, #tpu.memory_space<vmem>>, vector<8x64xf32>
    %57 = arith.addf %55, %56 : vector<8x64xf32>
    %c0_26 = arith.constant 0 : index
    %c0_27 = arith.constant 0 : index
    %c0_28 = arith.constant 0 : index
    %58 = vector.load %arg9[%c0_26, %c0_27, %c0_28] : memref<1x8x64xf32, #tpu.memory_space<vmem>>, vector<1x8x64xf32>
    %59 = vector.shape_cast %58 : vector<1x8x64xf32> to vector<8x64xf32>
    %60 = vector.shape_cast %57 : vector<8x64xf32> to vector<1x8x64xf32>
    tpu.vector_store %arg9[%c0_26, %c0_27, %c0_28], %60 {strides = array<i32>} : memref<1x8x64xf32, #tpu.memory_space<vmem>>, vector<1x8x64xf32>,
    return
  }
  func.func @transform_0(%arg0: i32) -> (i32, i32, i32) {
    %c0_i32 = arith.constant 0 : i32
    %c0_i32_0 = arith.constant 0 : i32
    %c0_i32_1 = arith.constant 0 : i32
    return %arg0, %c0_i32, %c0_i32_0 : i32, i32, i32
  }
  func.func @transform_1(%arg0: i32) -> (i32, i32) {
    %c0_i32 = arith.constant 0 : i32
    %c0_i32_0 = arith.constant 0 : i32
    %c0_i32_1 = arith.constant 0 : i32
    return %c0_i32, %c0_i32_0 : i32, i32
  }
  func.func @transform_2(%arg0: i32) -> (i32, i32) {
    %c0_i32 = arith.constant 0 : i32
    %c0_i32_0 = arith.constant 0 : i32
    %c0_i32_1 = arith.constant 0 : i32
    return %c0_i32, %c0_i32_0 : i32, i32
  }
  func.func @transform_3(%arg0: i32) -> (i32, i32) {
    %c0_i32 = arith.constant 0 : i32
    %c0_i32_0 = arith.constant 0 : i32
    %c0_i32_1 = arith.constant 0 : i32
    return %c0_i32, %c0_i32_0 : i32, i32
  }
  func.func @transform_4(%arg0: i32) -> (i32, i32) {
    %c0_i32 = arith.constant 0 : i32
    %c0_i32_0 = arith.constant 0 : i32
    %c0_i32_1 = arith.constant 0 : i32
    return %c0_i32, %c0_i32_0 : i32, i32
  }
  func.func @transform_5(%arg0: i32) -> (i32, i32) {
    %c0_i32 = arith.constant 0 : i32
    %c0_i32_0 = arith.constant 0 : i32
    %c0_i32_1 = arith.constant 0 : i32
    return %c0_i32, %c0_i32_0 : i32, i32
  }
  func.func @transform_6(%arg0: i32) -> (i32, i32) {
    %c0_i32 = arith.constant 0 : i32
    %c0_i32_0 = arith.constant 0 : i32
    %c0_i32_1 = arith.constant 0 : i32
    return %c0_i32, %c0_i32_0 : i32, i32
  }
  func.func @transform_7(%arg0: i32) -> (i32, i32) {
    %c0_i32 = arith.constant 0 : i32
    %c0_i32_0 = arith.constant 0 : i32
    %c0_i32_1 = arith.constant 0 : i32
    return %c0_i32, %c0_i32_0 : i32, i32
  }
  func.func @transform_8(%arg0: i32) -> (i32, i32, i32) {
    %c0_i32 = arith.constant 0 : i32
    %c0_i32_0 = arith.constant 0 : i32
    %c0_i32_1 = arith.constant 0 : i32
    return %arg0, %c0_i32, %c0_i32_0 : i32, i32, i32
  }
}

module attributes {stable_mosaic.version = 11 : i64} {
  func.func @_layer_kernel(%arg0: i32, %arg1: memref<1x8x64xf32, #tpu.memory_space<vmem>>, %arg2: memref<64x192xbf16, #tpu.memory_space<vmem>>, %arg3: memref<1x192xf32, #tpu.memory_space<vmem>>, %arg4: memref<64x64xbf16, #tpu.memory_space<vmem>>, %arg5: memref<1x64xf32, #tpu.memory_space<vmem>>, %arg6: memref<1x64xf32, #tpu.memory_space<vmem>>, %arg7: memref<1x64xf32, #tpu.memory_space<vmem>>, %arg8: memref<64x128xbf16, #tpu.memory_space<vmem>>, %arg9: memref<1x128xf32, #tpu.memory_space<vmem>>, %arg10: memref<128x64xbf16, #tpu.memory_space<vmem>>, %arg11: memref<1x64xf32, #tpu.memory_space<vmem>>, %arg12: memref<1x64xf32, #tpu.memory_space<vmem>>, %arg13: memref<1x64xf32, #tpu.memory_space<vmem>>, %arg14: memref<1x8x64xf32, #tpu.memory_space<vmem>>) attributes {dimension_semantics = [#tpu.dimension_semantics<parallel>], iteration_bounds = array<i64: 2>, scalar_prefetch = 0 : i64, scratch_operands = 0 : i64, tpu.core_type = #tpu.core_type<tc>, window_params = [{transform_indices = @transform_0, window_bounds = array<i64: 1, 8, 64>}, {pipeline_mode = #tpu.pipeline_mode<synchronous>, transform_indices = @transform_1, window_bounds = array<i64: 64, 192>}, {pipeline_mode = #tpu.pipeline_mode<synchronous>, transform_indices = @transform_2, window_bounds = array<i64: 1, 192>}, {pipeline_mode = #tpu.pipeline_mode<synchronous>, transform_indices = @transform_3, window_bounds = array<i64: 64, 64>}, {pipeline_mode = #tpu.pipeline_mode<synchronous>, transform_indices = @transform_4, window_bounds = array<i64: 1, 64>}, {pipeline_mode = #tpu.pipeline_mode<synchronous>, transform_indices = @transform_5, window_bounds = array<i64: 1, 64>}, {pipeline_mode = #tpu.pipeline_mode<synchronous>, transform_indices = @transform_6, window_bounds = array<i64: 1, 64>}, {pipeline_mode = #tpu.pipeline_mode<synchronous>, transform_indices = @transform_7, window_bounds = array<i64: 64, 128>}, {pipeline_mode = #tpu.pipeline_mode<synchronous>, transform_indices = @transform_8, window_bounds = array<i64: 1, 128>}, {pipeline_mode = #tpu.pipeline_mode<synchronous>, transform_indices = @transform_9, window_bounds = array<i64: 128, 64>}, {pipeline_mode = #tpu.pipeline_mode<synchronous>, transform_indices = @transform_10, window_bounds = array<i64: 1, 64>}, {pipeline_mode = #tpu.pipeline_mode<synchronous>, transform_indices = @transform_11, window_bounds = array<i64: 1, 64>}, {pipeline_mode = #tpu.pipeline_mode<synchronous>, transform_indices = @transform_12, window_bounds = array<i64: 1, 64>}, {transform_indices = @transform_13, window_bounds = array<i64: 1, 8, 64>}]} {
    %c0 = arith.constant 0 : index
    %c0_0 = arith.constant 0 : index
    %c0_1 = arith.constant 0 : index
    %0 = vector.load %arg1[%c0, %c0_0, %c0_1] : memref<1x8x64xf32, #tpu.memory_space<vmem>>, vector<1x8x64xf32>
    %1 = vector.shape_cast %0 : vector<1x8x64xf32> to vector<8x64xf32>
    %2 = arith.truncf %1 : vector<8x64xf32> to vector<8x64xbf16>
    %c0_2 = arith.constant 0 : index
    %c0_3 = arith.constant 0 : index
    %3 = vector.load %arg2[%c0_2, %c0_3] : memref<64x192xbf16, #tpu.memory_space<vmem>>, vector<64x192xbf16>
    %cst = arith.constant dense<0.000000e+00> : vector<8x192xf32>
    %4 = tpu.matmul %2, %3, %cst {dimension_numbers = #tpu.dot_dimension_numbers<[1], [0], [0], [1], [0, 0, 1, 1], [], []>} : vector<8x64xbf16>, vector<64x192xbf16>, vector<8x192xf32> -> vector<8x192xf32>
    %c0_4 = arith.constant 0 : index
    %c0_5 = arith.constant 0 : index
    %5 = vector.load %arg3[%c0_4, %c0_5] : memref<1x192xf32, #tpu.memory_space<vmem>>, vector<1x192xf32>
    %6 = vector.broadcast %5 : vector<1x192xf32> to vector<8x192xf32>
    %7 = arith.addf %4, %6 : vector<8x192xf32>
    %c0_6 = arith.constant 0 : index
    %c0_7 = arith.constant 0 : index
    %8 = vector.load %arg4[%c0_6, %c0_7] : memref<64x64xbf16, #tpu.memory_space<vmem>>, vector<64x64xbf16>
    %9 = vector.extract_strided_slice %7 {offsets = [0, 0], sizes = [8, 16], strides = [1, 1]} : vector<8x192xf32> to vector<8x16xf32>
    %10 = vector.extract_strided_slice %7 {offsets = [0, 64], sizes = [8, 16], strides = [1, 1]} : vector<8x192xf32> to vector<8x16xf32>
    %11 = vector.extract_strided_slice %7 {offsets = [0, 128], sizes = [8, 16], strides = [1, 1]} : vector<8x192xf32> to vector<8x16xf32>
    %cst_8 = arith.constant dense<0.000000e+00> : vector<8x8xf32>
    %12 = tpu.matmul %9, %10, %cst_8 {dimension_numbers = #tpu.dot_dimension_numbers<[1], [1], [0], [0], [0, 0, 1, 0], [], []>} : vector<8x16xf32>, vector<8x16xf32>, vector<8x8xf32> -> vector<8x8xf32>
    %cst_9 = arith.constant dense<0xFF800000> : vector<8xf32>
    %13 = vector.multi_reduction <maximumf>, %12, %cst_9 [1] : vector<8x8xf32> to vector<8xf32>
    %14 = vector.shape_cast %13 : vector<8xf32> to vector<8x1xf32>
    %15 = vector.broadcast %14 : vector<8x1xf32> to vector<8x8xf32>
    %16 = arith.subf %12, %15 : vector<8x8xf32>
    %17 = math.exp %16 : vector<8x8xf32>
    %cst_10 = arith.constant dense<0.000000e+00> : vector<8xf32>
    %18 = vector.multi_reduction <add>, %17, %cst_10 [1] : vector<8x8xf32> to vector<8xf32>
    %19 = vector.shape_cast %18 : vector<8xf32> to vector<8x1xf32>
    %20 = tpu.reciprocal %19 {approx = true} : vector<8x1xf32> -> vector<8x1xf32>
    %21 = vector.broadcast %20 : vector<8x1xf32> to vector<8x8xf32>
    %22 = arith.mulf %17, %21 : vector<8x8xf32>
    %cst_11 = arith.constant dense<0.000000e+00> : vector<8x16xf32>
    %23 = tpu.matmul %22, %11, %cst_11 {dimension_numbers = #tpu.dot_dimension_numbers<[1], [0], [0], [1], [0, 0, 1, 1], [], []>} : vector<8x8xf32>, vector<8x16xf32>, vector<8x16xf32> -> vector<8x16xf32>
    %24 = arith.truncf %23 : vector<8x16xf32> to vector<8x16xbf16>
    %25 = vector.extract_strided_slice %8 {offsets = [0, 0], sizes = [16, 64], strides = [1, 1]} : vector<64x64xbf16> to vector<16x64xbf16>
    %cst_12 = arith.constant dense<0.000000e+00> : vector<8x64xf32>
    %26 = tpu.matmul %24, %25, %cst_12 {dimension_numbers = #tpu.dot_dimension_numbers<[1], [0], [0], [1], [0, 0, 1, 1], [], []>} : vector<8x16xbf16>, vector<16x64xbf16>, vector<8x64xf32> -> vector<8x64xf32>
    %27 = vector.extract_strided_slice %7 {offsets = [0, 16], sizes = [8, 16], strides = [1, 1]} : vector<8x192xf32> to vector<8x16xf32>
    %28 = vector.extract_strided_slice %7 {offsets = [0, 80], sizes = [8, 16], strides = [1, 1]} : vector<8x192xf32> to vector<8x16xf32>
    %29 = vector.extract_strided_slice %7 {offsets = [0, 144], sizes = [8, 16], strides = [1, 1]} : vector<8x192xf32> to vector<8x16xf32>
    %cst_13 = arith.constant dense<0.000000e+00> : vector<8x8xf32>
    %30 = tpu.matmul %27, %28, %cst_13 {dimension_numbers = #tpu.dot_dimension_numbers<[1], [1], [0], [0], [0, 0, 1, 0], [], []>} : vector<8x16xf32>, vector<8x16xf32>, vector<8x8xf32> -> vector<8x8xf32>
    %cst_14 = arith.constant dense<0xFF800000> : vector<8xf32>
    %31 = vector.multi_reduction <maximumf>, %30, %cst_14 [1] : vector<8x8xf32> to vector<8xf32>
    %32 = vector.shape_cast %31 : vector<8xf32> to vector<8x1xf32>
    %33 = vector.broadcast %32 : vector<8x1xf32> to vector<8x8xf32>
    %34 = arith.subf %30, %33 : vector<8x8xf32>
    %35 = math.exp %34 : vector<8x8xf32>
    %cst_15 = arith.constant dense<0.000000e+00> : vector<8xf32>
    %36 = vector.multi_reduction <add>, %35, %cst_15 [1] : vector<8x8xf32> to vector<8xf32>
    %37 = vector.shape_cast %36 : vector<8xf32> to vector<8x1xf32>
    %38 = tpu.reciprocal %37 {approx = true} : vector<8x1xf32> -> vector<8x1xf32>
    %39 = vector.broadcast %38 : vector<8x1xf32> to vector<8x8xf32>
    %40 = arith.mulf %35, %39 : vector<8x8xf32>
    %cst_16 = arith.constant dense<0.000000e+00> : vector<8x16xf32>
    %41 = tpu.matmul %40, %29, %cst_16 {dimension_numbers = #tpu.dot_dimension_numbers<[1], [0], [0], [1], [0, 0, 1, 1], [], []>} : vector<8x8xf32>, vector<8x16xf32>, vector<8x16xf32> -> vector<8x16xf32>
    %42 = arith.truncf %41 : vector<8x16xf32> to vector<8x16xbf16>
    %43 = vector.extract_strided_slice %8 {offsets = [16, 0], sizes = [16, 64], strides = [1, 1]} : vector<64x64xbf16> to vector<16x64xbf16>
    %cst_17 = arith.constant dense<0.000000e+00> : vector<8x64xf32>
    %44 = tpu.matmul %42, %43, %cst_17 {dimension_numbers = #tpu.dot_dimension_numbers<[1], [0], [0], [1], [0, 0, 1, 1], [], []>} : vector<8x16xbf16>, vector<16x64xbf16>, vector<8x64xf32> -> vector<8x64xf32>
    %45 = arith.addf %26, %44 : vector<8x64xf32>
    %46 = vector.extract_strided_slice %7 {offsets = [0, 32], sizes = [8, 16], strides = [1, 1]} : vector<8x192xf32> to vector<8x16xf32>
    %47 = vector.extract_strided_slice %7 {offsets = [0, 96], sizes = [8, 16], strides = [1, 1]} : vector<8x192xf32> to vector<8x16xf32>
    %48 = vector.extract_strided_slice %7 {offsets = [0, 160], sizes = [8, 16], strides = [1, 1]} : vector<8x192xf32> to vector<8x16xf32>
    %cst_18 = arith.constant dense<0.000000e+00> : vector<8x8xf32>
    %49 = tpu.matmul %46, %47, %cst_18 {dimension_numbers = #tpu.dot_dimension_numbers<[1], [1], [0], [0], [0, 0, 1, 0], [], []>} : vector<8x16xf32>, vector<8x16xf32>, vector<8x8xf32> -> vector<8x8xf32>
    %cst_19 = arith.constant dense<0xFF800000> : vector<8xf32>
    %50 = vector.multi_reduction <maximumf>, %49, %cst_19 [1] : vector<8x8xf32> to vector<8xf32>
    %51 = vector.shape_cast %50 : vector<8xf32> to vector<8x1xf32>
    %52 = vector.broadcast %51 : vector<8x1xf32> to vector<8x8xf32>
    %53 = arith.subf %49, %52 : vector<8x8xf32>
    %54 = math.exp %53 : vector<8x8xf32>
    %cst_20 = arith.constant dense<0.000000e+00> : vector<8xf32>
    %55 = vector.multi_reduction <add>, %54, %cst_20 [1] : vector<8x8xf32> to vector<8xf32>
    %56 = vector.shape_cast %55 : vector<8xf32> to vector<8x1xf32>
    %57 = tpu.reciprocal %56 {approx = true} : vector<8x1xf32> -> vector<8x1xf32>
    %58 = vector.broadcast %57 : vector<8x1xf32> to vector<8x8xf32>
    %59 = arith.mulf %54, %58 : vector<8x8xf32>
    %cst_21 = arith.constant dense<0.000000e+00> : vector<8x16xf32>
    %60 = tpu.matmul %59, %48, %cst_21 {dimension_numbers = #tpu.dot_dimension_numbers<[1], [0], [0], [1], [0, 0, 1, 1], [], []>} : vector<8x8xf32>, vector<8x16xf32>, vector<8x16xf32> -> vector<8x16xf32>
    %61 = arith.truncf %60 : vector<8x16xf32> to vector<8x16xbf16>
    %62 = vector.extract_strided_slice %8 {offsets = [32, 0], sizes = [16, 64], strides = [1, 1]} : vector<64x64xbf16> to vector<16x64xbf16>
    %cst_22 = arith.constant dense<0.000000e+00> : vector<8x64xf32>
    %63 = tpu.matmul %61, %62, %cst_22 {dimension_numbers = #tpu.dot_dimension_numbers<[1], [0], [0], [1], [0, 0, 1, 1], [], []>} : vector<8x16xbf16>, vector<16x64xbf16>, vector<8x64xf32> -> vector<8x64xf32>
    %64 = arith.addf %45, %63 : vector<8x64xf32>
    %65 = vector.extract_strided_slice %7 {offsets = [0, 48], sizes = [8, 16], strides = [1, 1]} : vector<8x192xf32> to vector<8x16xf32>
    %66 = vector.extract_strided_slice %7 {offsets = [0, 112], sizes = [8, 16], strides = [1, 1]} : vector<8x192xf32> to vector<8x16xf32>
    %67 = vector.extract_strided_slice %7 {offsets = [0, 176], sizes = [8, 16], strides = [1, 1]} : vector<8x192xf32> to vector<8x16xf32>
    %cst_23 = arith.constant dense<0.000000e+00> : vector<8x8xf32>
    %68 = tpu.matmul %65, %66, %cst_23 {dimension_numbers = #tpu.dot_dimension_numbers<[1], [1], [0], [0], [0, 0, 1, 0], [], []>} : vector<8x16xf32>, vector<8x16xf32>, vector<8x8xf32> -> vector<8x8xf32>
    %cst_24 = arith.constant dense<0xFF800000> : vector<8xf32>
    %69 = vector.multi_reduction <maximumf>, %68, %cst_24 [1] : vector<8x8xf32> to vector<8xf32>
    %70 = vector.shape_cast %69 : vector<8xf32> to vector<8x1xf32>
    %71 = vector.broadcast %70 : vector<8x1xf32> to vector<8x8xf32>
    %72 = arith.subf %68, %71 : vector<8x8xf32>
    %73 = math.exp %72 : vector<8x8xf32>
    %cst_25 = arith.constant dense<0.000000e+00> : vector<8xf32>
    %74 = vector.multi_reduction <add>, %73, %cst_25 [1] : vector<8x8xf32> to vector<8xf32>
    %75 = vector.shape_cast %74 : vector<8xf32> to vector<8x1xf32>
    %76 = tpu.reciprocal %75 {approx = true} : vector<8x1xf32> -> vector<8x1xf32>
    %77 = vector.broadcast %76 : vector<8x1xf32> to vector<8x8xf32>
    %78 = arith.mulf %73, %77 : vector<8x8xf32>
    %cst_26 = arith.constant dense<0.000000e+00> : vector<8x16xf32>
    %79 = tpu.matmul %78, %67, %cst_26 {dimension_numbers = #tpu.dot_dimension_numbers<[1], [0], [0], [1], [0, 0, 1, 1], [], []>} : vector<8x8xf32>, vector<8x16xf32>, vector<8x16xf32> -> vector<8x16xf32>
    %80 = arith.truncf %79 : vector<8x16xf32> to vector<8x16xbf16>
    %81 = vector.extract_strided_slice %8 {offsets = [48, 0], sizes = [16, 64], strides = [1, 1]} : vector<64x64xbf16> to vector<16x64xbf16>
    %cst_27 = arith.constant dense<0.000000e+00> : vector<8x64xf32>
    %82 = tpu.matmul %80, %81, %cst_27 {dimension_numbers = #tpu.dot_dimension_numbers<[1], [0], [0], [1], [0, 0, 1, 1], [], []>} : vector<8x16xbf16>, vector<16x64xbf16>, vector<8x64xf32> -> vector<8x64xf32>
    %83 = arith.addf %64, %82 : vector<8x64xf32>
    %c0_28 = arith.constant 0 : index
    %c0_29 = arith.constant 0 : index
    %84 = vector.load %arg5[%c0_28, %c0_29] : memref<1x64xf32, #tpu.memory_space<vmem>>, vector<1x64xf32>
    %85 = vector.broadcast %84 : vector<1x64xf32> to vector<8x64xf32>
    %86 = arith.addf %83, %85 : vector<8x64xf32>
    %87 = arith.addf %86, %1 : vector<8x64xf32>
    %c0_30 = arith.constant 0 : index
    %c0_31 = arith.constant 0 : index
    %88 = vector.load %arg6[%c0_30, %c0_31] : memref<1x64xf32, #tpu.memory_space<vmem>>, vector<1x64xf32>
    %c0_32 = arith.constant 0 : index
    %c0_33 = arith.constant 0 : index
    %89 = vector.load %arg7[%c0_32, %c0_33] : memref<1x64xf32, #tpu.memory_space<vmem>>, vector<1x64xf32>
    %cst_34 = arith.constant dense<0.000000e+00> : vector<8xf32>
    %90 = vector.multi_reduction <add>, %87, %cst_34 [1] : vector<8x64xf32> to vector<8xf32>
    %91 = vector.shape_cast %90 : vector<8xf32> to vector<8x1xf32>
    %cst_35 = arith.constant 6.400000e+01 : f32
    %92 = vector.broadcast %cst_35 : f32 to vector<8x1xf32>
    %93 = arith.divf %91, %92 : vector<8x1xf32>
    %94 = vector.broadcast %93 : vector<8x1xf32> to vector<8x64xf32>
    %95 = arith.subf %87, %94 : vector<8x64xf32>
    %96 = arith.mulf %95, %95 : vector<8x64xf32>
    %cst_36 = arith.constant dense<0.000000e+00> : vector<8xf32>
    %97 = vector.multi_reduction <add>, %96, %cst_36 [1] : vector<8x64xf32> to vector<8xf32>
    %98 = vector.shape_cast %97 : vector<8xf32> to vector<8x1xf32>
    %cst_37 = arith.constant 6.400000e+01 : f32
    %99 = vector.broadcast %cst_37 : f32 to vector<8x1xf32>
    %100 = arith.divf %98, %99 : vector<8x1xf32>
    %101 = vector.broadcast %93 : vector<8x1xf32> to vector<8x64xf32>
    %102 = arith.subf %87, %101 : vector<8x64xf32>
    %cst_38 = arith.constant 9.99999974E-6 : f32
    %103 = vector.broadcast %cst_38 : f32 to vector<8x1xf32>
    %104 = arith.addf %100, %103 : vector<8x1xf32>
    %105 = math.rsqrt %104 : vector<8x1xf32>
    %106 = vector.broadcast %105 : vector<8x1xf32> to vector<8x64xf32>
    %107 = arith.mulf %102, %106 : vector<8x64xf32>
    %108 = vector.broadcast %88 : vector<1x64xf32> to vector<8x64xf32>
    %109 = arith.mulf %107, %108 : vector<8x64xf32>
    %110 = vector.broadcast %89 : vector<1x64xf32> to vector<8x64xf32>
    %111 = arith.addf %109, %110 : vector<8x64xf32>
    %112 = arith.truncf %111 : vector<8x64xf32> to vector<8x64xbf16>
    %c0_39 = arith.constant 0 : index
    %c0_40 = arith.constant 0 : index
    %113 = vector.load %arg8[%c0_39, %c0_40] : memref<64x128xbf16, #tpu.memory_space<vmem>>, vector<64x128xbf16>
    %cst_41 = arith.constant dense<0.000000e+00> : vector<8x128xf32>
    %114 = tpu.matmul %112, %113, %cst_41 {dimension_numbers = #tpu.dot_dimension_numbers<[1], [0], [0], [1], [0, 0, 1, 1], [], []>} : vector<8x64xbf16>, vector<64x128xbf16>, vector<8x128xf32> -> vector<8x128xf32>
    %c0_42 = arith.constant 0 : index
    %c0_43 = arith.constant 0 : index
    %115 = vector.load %arg9[%c0_42, %c0_43] : memref<1x128xf32, #tpu.memory_space<vmem>>, vector<1x128xf32>
    %116 = vector.broadcast %115 : vector<1x128xf32> to vector<8x128xf32>
    %117 = arith.addf %114, %116 : vector<8x128xf32>
    %cst_44 = arith.constant 0.000000e+00 : f32
    %118 = vector.broadcast %cst_44 : f32 to vector<8x128xf32>
    %119 = arith.maximumf %117, %118 : vector<8x128xf32>
    %120 = arith.truncf %119 : vector<8x128xf32> to vector<8x128xbf16>
    %c0_45 = arith.constant 0 : index
    %c0_46 = arith.constant 0 : index
    %121 = vector.load %arg10[%c0_45, %c0_46] : memref<128x64xbf16, #tpu.memory_space<vmem>>, vector<128x64xbf16>
    %cst_47 = arith.constant dense<0.000000e+00> : vector<8x64xf32>
    %122 = tpu.matmul %120, %121, %cst_47 {dimension_numbers = #tpu.dot_dimension_numbers<[1], [0], [0], [1], [0, 0, 1, 1], [], []>} : vector<8x128xbf16>, vector<128x64xbf16>, vector<8x64xf32> -> vector<8x64xf32>
    %c0_48 = arith.constant 0 : index
    %c0_49 = arith.constant 0 : index
    %123 = vector.load %arg11[%c0_48, %c0_49] : memref<1x64xf32, #tpu.memory_space<vmem>>, vector<1x64xf32>
    %124 = vector.broadcast %123 : vector<1x64xf32> to vector<8x64xf32>
    %125 = arith.addf %122, %124 : vector<8x64xf32>
    %126 = arith.addf %125, %111 : vector<8x64xf32>
    %c0_50 = arith.constant 0 : index
    %c0_51 = arith.constant 0 : index
    %127 = vector.load %arg12[%c0_50, %c0_51] : memref<1x64xf32, #tpu.memory_space<vmem>>, vector<1x64xf32>
    %c0_52 = arith.constant 0 : index
    %c0_53 = arith.constant 0 : index
    %128 = vector.load %arg13[%c0_52, %c0_53] : memref<1x64xf32, #tpu.memory_space<vmem>>, vector<1x64xf32>
    %cst_54 = arith.constant dense<0.000000e+00> : vector<8xf32>
    %129 = vector.multi_reduction <add>, %126, %cst_54 [1] : vector<8x64xf32> to vector<8xf32>
    %130 = vector.shape_cast %129 : vector<8xf32> to vector<8x1xf32>
    %cst_55 = arith.constant 6.400000e+01 : f32
    %131 = vector.broadcast %cst_55 : f32 to vector<8x1xf32>
    %132 = arith.divf %130, %131 : vector<8x1xf32>
    %133 = vector.broadcast %132 : vector<8x1xf32> to vector<8x64xf32>
    %134 = arith.subf %126, %133 : vector<8x64xf32>
    %135 = arith.mulf %134, %134 : vector<8x64xf32>
    %cst_56 = arith.constant dense<0.000000e+00> : vector<8xf32>
    %136 = vector.multi_reduction <add>, %135, %cst_56 [1] : vector<8x64xf32> to vector<8xf32>
    %137 = vector.shape_cast %136 : vector<8xf32> to vector<8x1xf32>
    %cst_57 = arith.constant 6.400000e+01 : f32
    %138 = vector.broadcast %cst_57 : f32 to vector<8x1xf32>
    %139 = arith.divf %137, %138 : vector<8x1xf32>
    %140 = vector.broadcast %132 : vector<8x1xf32> to vector<8x64xf32>
    %141 = arith.subf %126, %140 : vector<8x64xf32>
    %cst_58 = arith.constant 9.99999974E-6 : f32
    %142 = vector.broadcast %cst_58 : f32 to vector<8x1xf32>
    %143 = arith.addf %139, %142 : vector<8x1xf32>
    %144 = math.rsqrt %143 : vector<8x1xf32>
    %145 = vector.broadcast %144 : vector<8x1xf32> to vector<8x64xf32>
    %146 = arith.mulf %141, %145 : vector<8x64xf32>
    %147 = vector.broadcast %127 : vector<1x64xf32> to vector<8x64xf32>
    %148 = arith.mulf %146, %147 : vector<8x64xf32>
    %149 = vector.broadcast %128 : vector<1x64xf32> to vector<8x64xf32>
    %150 = arith.addf %148, %149 : vector<8x64xf32>
    %c0_59 = arith.constant 0 : index
    %c0_60 = arith.constant 0 : index
    %c0_61 = arith.constant 0 : index
    %151 = vector.load %arg14[%c0_59, %c0_60, %c0_61] : memref<1x8x64xf32, #tpu.memory_space<vmem>>, vector<1x8x64xf32>
    %152 = vector.shape_cast %151 : vector<1x8x64xf32> to vector<8x64xf32>
    %153 = vector.shape_cast %150 : vector<8x64xf32> to vector<1x8x64xf32>
    tpu.vector_store %arg14[%c0_59, %c0_60, %c0_61], %153 {strides = array<i32>} : memref<1x8x64xf32, #tpu.memory_space<vmem>>, vector<1x8x64xf32>,
    return
  }
  func.func @transform_0(%arg0: i32) -> (i32, i32, i32) {
    %c0_i32 = arith.constant 0 : i32
    %c0_i32_0 = arith.constant 0 : i32
    %c0_i32_1 = arith.constant 0 : i32
    return %arg0, %c0_i32, %c0_i32_0 : i32, i32, i32
  }
  func.func @transform_1(%arg0: i32) -> (i32, i32) {
    %c0_i32 = arith.constant 0 : i32
    %c0_i32_0 = arith.constant 0 : i32
    %c0_i32_1 = arith.constant 0 : i32
    return %c0_i32, %c0_i32_0 : i32, i32
  }
  func.func @transform_2(%arg0: i32) -> (i32, i32) {
    %c0_i32 = arith.constant 0 : i32
    %c0_i32_0 = arith.constant 0 : i32
    %c0_i32_1 = arith.constant 0 : i32
    return %c0_i32, %c0_i32_0 : i32, i32
  }
  func.func @transform_3(%arg0: i32) -> (i32, i32) {
    %c0_i32 = arith.constant 0 : i32
    %c0_i32_0 = arith.constant 0 : i32
    %c0_i32_1 = arith.constant 0 : i32
    return %c0_i32, %c0_i32_0 : i32, i32
  }
  func.func @transform_4(%arg0: i32) -> (i32, i32) {
    %c0_i32 = arith.constant 0 : i32
    %c0_i32_0 = arith.constant 0 : i32
    %c0_i32_1 = arith.constant 0 : i32
    return %c0_i32, %c0_i32_0 : i32, i32
  }
  func.func @transform_5(%arg0: i32) -> (i32, i32) {
    %c0_i32 = arith.constant 0 : i32
    %c0_i32_0 = arith.constant 0 : i32
    %c0_i32_1 = arith.constant 0 : i32
    return %c0_i32, %c0_i32_0 : i32, i32
  }
  func.func @transform_6(%arg0: i32) -> (i32, i32) {
    %c0_i32 = arith.constant 0 : i32
    %c0_i32_0 = arith.constant 0 : i32
    %c0_i32_1 = arith.constant 0 : i32
    return %c0_i32, %c0_i32_0 : i32, i32
  }
  func.func @transform_7(%arg0: i32) -> (i32, i32) {
    %c0_i32 = arith.constant 0 : i32
    %c0_i32_0 = arith.constant 0 : i32
    %c0_i32_1 = arith.constant 0 : i32
    return %c0_i32, %c0_i32_0 : i32, i32
  }
  func.func @transform_8(%arg0: i32) -> (i32, i32) {
    %c0_i32 = arith.constant 0 : i32
    %c0_i32_0 = arith.constant 0 : i32
    %c0_i32_1 = arith.constant 0 : i32
    return %c0_i32, %c0_i32_0 : i32, i32
  }
  func.func @transform_9(%arg0: i32) -> (i32, i32) {
    %c0_i32 = arith.constant 0 : i32
    %c0_i32_0 = arith.constant 0 : i32
    %c0_i32_1 = arith.constant 0 : i32
    return %c0_i32, %c0_i32_0 : i32, i32
  }
  func.func @transform_10(%arg0: i32) -> (i32, i32) {
    %c0_i32 = arith.constant 0 : i32
    %c0_i32_0 = arith.constant 0 : i32
    %c0_i32_1 = arith.constant 0 : i32
    return %c0_i32, %c0_i32_0 : i32, i32
  }
  func.func @transform_11(%arg0: i32) -> (i32, i32) {
    %c0_i32 = arith.constant 0 : i32
    %c0_i32_0 = arith.constant 0 : i32
    %c0_i32_1 = arith.constant 0 : i32
    return %c0_i32, %c0_i32_0 : i32, i32
  }
  func.func @transform_12(%arg0: i32) -> (i32, i32) {
    %c0_i32 = arith.constant 0 : i32
    %c0_i32_0 = arith.constant 0 : i32
    %c0_i32_1 = arith.constant 0 : i32
    return %c0_i32, %c0_i32_0 : i32, i32
  }
  func.func @transform_13(%arg0: i32) -> (i32, i32, i32) {
    %c0_i32 = arith.constant 0 : i32
    %c0_i32_0 = arith.constant 0 : i32
    %c0_i32_1 = arith.constant 0 : i32
    return %arg0, %c0_i32, %c0_i32_0 : i32, i32, i32
  }
}

module attributes {stable_mosaic.version = 11 : i64} {
  func.func @_head_kernel(%arg0: i32, %arg1: memref<2x64xf32, #tpu.memory_space<vmem>>, %arg2: memref<1x64xf32, #tpu.memory_space<vmem>>, %arg3: memref<1x64xf32, #tpu.memory_space<vmem>>, %arg4: memref<64x6xbf16, #tpu.memory_space<vmem>>, %arg5: memref<2x6xf32, #tpu.memory_space<vmem>>) attributes {dimension_semantics = [#tpu.dimension_semantics<arbitrary>], iteration_bounds = array<i64: 1>, scalar_prefetch = 0 : i64, scratch_operands = 0 : i64, tpu.core_type = #tpu.core_type<tc>, window_params = [{pipeline_mode = #tpu.pipeline_mode<synchronous>, transform_indices = @transform_0, window_bounds = array<i64: 2, 64>}, {pipeline_mode = #tpu.pipeline_mode<synchronous>, transform_indices = @transform_1, window_bounds = array<i64: 1, 64>}, {pipeline_mode = #tpu.pipeline_mode<synchronous>, transform_indices = @transform_2, window_bounds = array<i64: 1, 64>}, {pipeline_mode = #tpu.pipeline_mode<synchronous>, transform_indices = @transform_3, window_bounds = array<i64: 64, 6>}, {pipeline_mode = #tpu.pipeline_mode<synchronous>, transform_indices = @transform_4, window_bounds = array<i64: 2, 6>}]} {
    %c0 = arith.constant 0 : index
    %c0_0 = arith.constant 0 : index
    %0 = vector.load %arg1[%c0, %c0_0] : memref<2x64xf32, #tpu.memory_space<vmem>>, vector<2x64xf32>
    %c0_1 = arith.constant 0 : index
    %c0_2 = arith.constant 0 : index
    %1 = vector.load %arg2[%c0_1, %c0_2] : memref<1x64xf32, #tpu.memory_space<vmem>>, vector<1x64xf32>
    %c0_3 = arith.constant 0 : index
    %c0_4 = arith.constant 0 : index
    %2 = vector.load %arg3[%c0_3, %c0_4] : memref<1x64xf32, #tpu.memory_space<vmem>>, vector<1x64xf32>
    %cst = arith.constant dense<0.000000e+00> : vector<2xf32>
    %3 = vector.multi_reduction <add>, %0, %cst [1] : vector<2x64xf32> to vector<2xf32>
    %4 = vector.shape_cast %3 : vector<2xf32> to vector<2x1xf32>
    %cst_5 = arith.constant 6.400000e+01 : f32
    %5 = vector.broadcast %cst_5 : f32 to vector<2x1xf32>
    %6 = arith.divf %4, %5 : vector<2x1xf32>
    %7 = vector.broadcast %6 : vector<2x1xf32> to vector<2x64xf32>
    %8 = arith.subf %0, %7 : vector<2x64xf32>
    %9 = arith.mulf %8, %8 : vector<2x64xf32>
    %cst_6 = arith.constant dense<0.000000e+00> : vector<2xf32>
    %10 = vector.multi_reduction <add>, %9, %cst_6 [1] : vector<2x64xf32> to vector<2xf32>
    %11 = vector.shape_cast %10 : vector<2xf32> to vector<2x1xf32>
    %cst_7 = arith.constant 6.400000e+01 : f32
    %12 = vector.broadcast %cst_7 : f32 to vector<2x1xf32>
    %13 = arith.divf %11, %12 : vector<2x1xf32>
    %14 = vector.broadcast %6 : vector<2x1xf32> to vector<2x64xf32>
    %15 = arith.subf %0, %14 : vector<2x64xf32>
    %cst_8 = arith.constant 9.99999974E-6 : f32
    %16 = vector.broadcast %cst_8 : f32 to vector<2x1xf32>
    %17 = arith.addf %13, %16 : vector<2x1xf32>
    %18 = math.rsqrt %17 : vector<2x1xf32>
    %19 = vector.broadcast %18 : vector<2x1xf32> to vector<2x64xf32>
    %20 = arith.mulf %15, %19 : vector<2x64xf32>
    %21 = vector.broadcast %1 : vector<1x64xf32> to vector<2x64xf32>
    %22 = arith.mulf %20, %21 : vector<2x64xf32>
    %23 = vector.broadcast %2 : vector<1x64xf32> to vector<2x64xf32>
    %24 = arith.addf %22, %23 : vector<2x64xf32>
    %25 = arith.truncf %24 : vector<2x64xf32> to vector<2x64xbf16>
    %c0_9 = arith.constant 0 : index
    %c0_10 = arith.constant 0 : index
    %26 = vector.load %arg4[%c0_9, %c0_10] : memref<64x6xbf16, #tpu.memory_space<vmem>>, vector<64x6xbf16>
    %cst_11 = arith.constant dense<0.000000e+00> : vector<2x6xf32>
    %27 = tpu.matmul %25, %26, %cst_11 {dimension_numbers = #tpu.dot_dimension_numbers<[1], [0], [0], [1], [0, 0, 1, 1], [], []>} : vector<2x64xbf16>, vector<64x6xbf16>, vector<2x6xf32> -> vector<2x6xf32>
    %cst_12 = arith.constant dense<0xFF800000> : vector<2xf32>
    %28 = vector.multi_reduction <maximumf>, %27, %cst_12 [1] : vector<2x6xf32> to vector<2xf32>
    %29 = vector.shape_cast %28 : vector<2xf32> to vector<2x1xf32>
    %30 = vector.broadcast %29 : vector<2x1xf32> to vector<2x6xf32>
    %31 = arith.subf %27, %30 : vector<2x6xf32>
    %32 = math.exp %31 : vector<2x6xf32>
    %cst_13 = arith.constant dense<0.000000e+00> : vector<2xf32>
    %33 = vector.multi_reduction <add>, %32, %cst_13 [1] : vector<2x6xf32> to vector<2xf32>
    %34 = vector.shape_cast %33 : vector<2xf32> to vector<2x1xf32>
    %35 = math.log %34 : vector<2x1xf32>
    %36 = vector.broadcast %35 : vector<2x1xf32> to vector<2x6xf32>
    %37 = arith.subf %31, %36 : vector<2x6xf32>
    %c0_14 = arith.constant 0 : index
    %c0_15 = arith.constant 0 : index
    %38 = vector.load %arg5[%c0_14, %c0_15] : memref<2x6xf32, #tpu.memory_space<vmem>>, vector<2x6xf32>
    tpu.vector_store %arg5[%c0_14, %c0_15], %37 {strides = array<i32>} : memref<2x6xf32, #tpu.memory_space<vmem>>, vector<2x6xf32>,
    return
  }
  func.func @transform_0(%arg0: i32) -> (i32, i32) {
    %c0_i32 = arith.constant 0 : i32
    %c0_i32_0 = arith.constant 0 : i32
    %c0_i32_1 = arith.constant 0 : i32
    return %c0_i32, %c0_i32_0 : i32, i32
  }
  func.func @transform_1(%arg0: i32) -> (i32, i32) {
    %c0_i32 = arith.constant 0 : i32
    %c0_i32_0 = arith.constant 0 : i32
    %c0_i32_1 = arith.constant 0 : i32
    return %c0_i32, %c0_i32_0 : i32, i32
  }
  func.func @transform_2(%arg0: i32) -> (i32, i32) {
    %c0_i32 = arith.constant 0 : i32
    %c0_i32_0 = arith.constant 0 : i32
    %c0_i32_1 = arith.constant 0 : i32
    return %c0_i32, %c0_i32_0 : i32, i32
  }
  func.func @transform_3(%arg0: i32) -> (i32, i32) {
    %c0_i32 = arith.constant 0 : i32
    %c0_i32_0 = arith.constant 0 : i32
    %c0_i32_1 = arith.constant 0 : i32
    return %c0_i32, %c0_i32_0 : i32, i32
  }
  func.func @transform_4(%arg0: i32) -> (i32, i32) {
    %c0_i32 = arith.constant 0 : i32
    %c0_i32_0 = arith.constant 0 : i32
    %c0_i32_1 = arith.constant 0 : i32
    return %c0_i32, %c0_i32_0 : i32, i32
  }
}

</mosaic_0001>

<bundles_post_ra>
// kernel: transformer_forward.4
= control target key start
LH: loop header
LB: loop body
LE: loop exit
PB: predicated region body
PF: predicated region fallthrough
CT: control target
= control target key end

     0   :  { %s582_s27 = smov 0   ;;  %s633_s0 = inlined_call_operand.vmem [shape: f32[2,8,13], index: 0, kind: input, shape index: {}]   ;;  %s634_s1 = inlined_call_operand.vmem [shape: f32[1,13], index: 1, kind: input, shape index: {}]   ;;  %s635_s2 = inlined_call_operand.vmem [shape: f32[1,13], index: 2, kind: input, shape index: {}]   ;;  %s636_s3 = inlined_call_operand.vmem [shape: bf16[13,64], index: 3, kind: input, shape index: {}]   ;;  %s637_s4 = inlined_call_operand.vmem [shape: f32[1,64], index: 4, kind: input, shape index: {}]   ;;  %s638_s5 = inlined_call_operand.vmem [shape: f32[1,64], index: 5, kind: input, shape index: {}]   ;;  %s639_s6 = inlined_call_operand.vmem [shape: f32[1,64], index: 6, kind: input, shape index: {}]   ;;  %s640_s7 = inlined_call_operand.vmem [shape: f32[8,64], index: 7, kind: input, shape index: {}]   ;;  %s641_s8 = inlined_call_operand.vmem [shape: f32[2,8,64], index: 8, kind: output, shape index: {}]  }
   0x1 LB: > { %s486_s28 = sadd.s32 4294967295, %s532_s27   ;;  %p490_p0 = scmp.ge.s32.totalorder %s532_s27, 1  ;;  %s532_s27 = sphi %s582_s27, %s18_s27  }
   0x2   : > { %p261_p1 = scmp.lt.s32.totalorder %s532_s27, 3 }
   0x4   : > { %p262_p2 = pnand %p490_p0, %p261_p1 }
   0x5   : > { %p293_p3 = scmp.lt.s32.totalorder (!%p262_p2), %s486_s28, 1  ;;  %vm305_vm0 = vcmask (!%p262_p2), 105472   ;;  %v521_v7 = vld [vmem:[%s636_s3] sm:$0x7f] (!%p262_p2)   ;;  %vm352_vm1 = vcmask (!%p262_p2), 1045504   ;;  %vm353_vm2 = vcmask (!%p262_p2), 1046528  }
   0x6   : > { %265 = sbr.rel (%p262_p2) target bundleno = 862 (0x35e), region = 52  ;;  %v534_v8 = vmov (!%p262_p2), 0.0   ;;  %v535_v9 = vmov (!%p262_p2), 65535   ;;  %vm536_vm3 = vmmov (!%p262_p2), 0   ;;  %v493_v17 = vld [vmem:[%s634_s1] ss:$0 sm:$0xff] (!%p262_p2) }
   0x7   : > { %504 = vmatprep.subr.bf16.mxu0 (!%p262_p2), %v534_v8  ;;  %v354_v10 = vsel (!%p262_p2), %vm352_vm1, 4294967295, %v535_v9  ;;  %506 = vmatprep.mubr.msk.bf16.mxu0 (!%p262_p2), %vm536_vm3, %v534_v8  ;;  %v494_v19 = vld [vmem:[%s635_s2] ss:$0 sm:$0xff] (!%p262_p2)  ;;  %vm401_vm4 = vcmask (!%p262_p2), 523264  }
   0x8   : > { %v355_v11 = vsel (!%p262_p2), %vm353_vm2, %v354_v10, 0  ;;  %v495_v23 = vld [vmem:[%s637_s4] ss:$0 sm:$0xff] (!%p262_p2) }
   0x9   : > { %v357_v12 = vand.u32 (!%p262_p2), %v521_v7, %v355_v11  ;;  %v498_v39 = vld [vmem:[%s638_s5] ss:$0 sm:$0xff] (!%p262_p2) }
   0xa   : > { %v499_v41 = vld [vmem:[%s639_s6] ss:$0 sm:$0xff] (!%p262_p2) }
   0xb   : > { %505 = vmatpush3.bf16.msra.mxu0 (!%p262_p2), %v357_v12  ;;  %v430_v43 = vld [vmem:[%s640_s7] sm:$0xff] (!%p262_p2) }
   0xd   : > { %s643_s28 = smov (!%p293_p3, %s486_s28), 1 }
   0xe   : > { %s491_s29 = sshll.u32 %s643_s28, 3 }
   0xf   : > { %s296_s10 = scalar_lea.vmem %s633_s0, %s491_s29  ;;  %s300_s30 = scalar_lea.vmem %s641_s8, %s491_s29 }
  0x10   : > { %v302_v0 = vld [vmem:[%s296_s10] sm:$0xff] }
  0x11   : > { %v306_v1 = vsel %vm305_vm0, %v302_v0, 0.0 }
  0x12   : > { %307 = vadd.xlane.f32.xlu0 %v306_v1 }
  0x9f   : > { %v308_v2 = vpop.xlane.xlu0 %307 }
  0xa0   : > { %v310_v3 = vmul.f32 0.07692308, %v308_v2 }
  0xa2   : > { %v311_v4 = vsub.f32 %v302_v0, %v310_v3 }
  0xa4   : > { %v312_v5 = vmul.f32 %v311_v4, %v311_v4 }
  0xa6   : > { %v313_v6 = vsel %vm305_vm0, %v312_v5, 0.0 }
  0xa7   : > { %314 = vadd.xlane.f32.xlu0 %v313_v6 }
 0x134   : > { %v315_v13 = vpop.xlane.xlu0 %314 }
 0x135   : > { %v316_v14 = vmul.f32 0.07692308, %v315_v13 }
 0x137   : > { %v317_v15 = vadd.f32 1e-05, %v316_v14 }
 0x139   : > { %522 = vrsqrt.f32 %v317_v15 }
 0x143   : > { %v523_v16 = vpop.eup %522 }
 0x144   : > { %v319_v18 = vmul.f32 %v523_v16, %v311_v4 }
 0x146   : > { %v326_v20 = vmul.f32 %v493_v17, %v319_v18 }
 0x148   : > { %v333_v21 = vadd.f32 %v494_v19, %v326_v20 }
 0x14a   : > { %v334_v22 = vpack.c.bf16 %v333_v21, %v333_v21 }
 0x14c   : > { %507 = vmatmul.mubr.msk.bf16.vlgmr.msra.gmra.mrb[0].mxu0 %vm305_vm0, %v334_v22 }
 0x21f   : > { %v393_v24 = vpop.f32.mrb[0].mxu0 }
 0x220   : > { %v394_v25 = vadd.f32 %v495_v23, %v393_v24  ;;  %v508_v26 = vpop.f32.mrb[1].mxu0 }
 0x221   : > { %v396_v27 = vpop.f32.mrb[2].mxu0 }
 0x222   : > { %v509_v28 = vpop.f32.mrb[3].mxu0  ;;  %v402_v29 = vsel %vm401_vm4, %v394_v25, 0.0 }
 0x223   : > { %403 = vadd.xlane.f32.xlu1 %v402_v29 }
 0x2b0   : > { %v404_v30 = vpop.xlane.xlu1 %403 }
 0x2b1   : > { %v406_v31 = vmul.f32 0.015625, %v404_v30 }
 0x2b3   : > { %v407_v32 = vsub.f32 %v394_v25, %v406_v31 }
 0x2b5   : > { %v408_v33 = vmul.f32 %v407_v32, %v407_v32 }
 0x2b7   : > { %v409_v34 = vsel %vm401_vm4, %v408_v33, 0.0 }
 0x2b8   : > { %410 = vadd.xlane.f32.xlu1 %v409_v34 }
 0x345   : > { %v411_v35 = vpop.xlane.xlu1 %410 }
 0x346   : > { %v412_v36 = vmul.f32 0.015625, %v411_v35 }
 0x348   : > { %v413_v37 = vadd.f32 1e-05, %v412_v36 }
 0x34a   : > { %524 = vrsqrt.f32 %v413_v37 }
 0x354   : > { %v525_v38 = vpop.eup %524 }
 0x355   : > { %v415_v40 = vmul.f32 %v525_v38, %v407_v32 }
 0x357   : > { %v422_v42 = vmul.f32 %v498_v39, %v415_v40 }
 0x359   : > { %v429_v44 = vadd.f32 %v499_v41, %v422_v42 }
 0x35b   : > { %v431_v45 = vadd.f32 %v430_v43, %v429_v44 }
 0x35d   : > { %432 = vst.msk [vmem:[%s300_s30] sm:$0xff] %vm401_vm4, %v431_v45 }
 0x35e PF: > { %s18_s27 = sadd.s32 1, %s532_s27  }
 0x35f   : > { %p15_p4 = scmp.ge.s32.totalorder %s18_s27, 4  }
 0x361   :  { %17 = sbr.rel (!%p15_p4) target bundleno = 1 (0x1), region = 82 }

// kernel: transformer_forward.7
= control target key start
LH: loop header
LB: loop body
LE: loop exit
PB: predicated region body
PF: predicated region fallthrough
CT: control target
= control target key end

     0   :  { %vm22_vm0 = vcmask 517120   ;;  %s281_s0 = inlined_call_operand.vmem [shape: f32[2,64], index: 0, kind: input, shape index: {}]   ;;  %s282_s1 = inlined_call_operand.vmem [shape: f32[1,64], index: 1, kind: input, shape index: {}]   ;;  %s283_s2 = inlined_call_operand.vmem [shape: f32[1,64], index: 2, kind: input, shape index: {}]   ;;  %s284_s3 = inlined_call_operand.vmem [shape: bf16[64,6], index: 3, kind: input, shape index: {}]   ;;  %s285_s4 = inlined_call_operand.hbm [shape: f32[2,6], index: 4, kind: output, shape index: {}]  }
   0x1   :  { %v19_v0 = vld [vmem:[%s281_s0] sm:$0x3] }
   0x2   :  { %v23_v1 = vsel %vm22_vm0, %v19_v0, 0.0 }
   0x3   :  { %24 = vadd.xlane.f32.xlu0 %v23_v1 }
   0x4   :  { %9 = vsyncpa [#allocation3], 0  ;;  %v183_v7 = vld [vmem:[%s284_s3] sm:$0xff]   ;;  %v217_v8 = vmov 0.0   ;;  %v184_v9 = vld [vmem:[%s284_s3 + $0x8] sm:$0xff]   ;;  %vm218_vm1 = vmmov 0  }
   0x5   :  { %168 = vmatprep.subr.bf16.mxu0 %v217_v8  ;;  %v185_v10 = vld [vmem:[%s284_s3 + $0x10] sm:$0xff]   ;;  %v186_v11 = vld [vmem:[%s284_s3 + $0x18] sm:$0xff]   ;;  %176 = vmatprep.mubr.msk.bf16.mxu0 %vm218_vm1, %v217_v8  ;;  %v156_v16 = vld [vmem:[%s282_s1] ss:$0 sm:$0xff]  ;;  %vm84_vm2 = vcmask 523264   ;;  %vm128_vm3 = vcmask 41984  }
   0x6   :  { %169 = vmatpush3.bf16.msra.mxu0 %v183_v7  ;;  %v157_v18 = vld [vmem:[%s283_s2] ss:$0 sm:$0xff]  ;;  %s219_s1 = smov [#allocation2]  }
   0x7   :  { %170 = vmatprep.subr.bf16.mxu0 %v217_v8  ;;  %s148_s2 = sshll.u32 %s219_s1, 4  ;;  %s149_s2 = int_to_ptr.vmem [resolvable:$true] %s148_s2 }
   0x8   :  { %s193_s3 = scalar_lea.vmem %s149_s2, 32  ;;  %p198_p1 = scmp.lt.s32.totalorder %s149_s2, %s149_s2 }
   0x9   :  { %p194_p0 = scmp.ne.s32.totalorder %s149_s2, %s193_s3  ;;  %p199_p2 = scmp.lt.s32.totalorder %s193_s3, %s193_s3 }
   0xa   :  { %171 = vmatpush3.bf16.msra.mxu0 %v184_v9 }
   0xb   :  { %172 = vmatprep.subr.bf16.mxu0 %v217_v8  ;;  %p200_p3 = por %p199_p2, %p198_p1 }
   0xd   :  { %p201_p4 = pnand %p200_p3, %p194_p0 }
   0xe   :  { %173 = vmatpush3.bf16.msra.mxu0 %v185_v10 }
   0xf   :  { %174 = vmatprep.subr.bf16.mxu0 %v217_v8 }
  0x12   :  { %175 = vmatpush3.bf16.msra.mxu0 %v186_v11 }
  0x90   :  { %v25_v2 = vpop.xlane.xlu0 %24 }
  0x91   :  { %v27_v3 = vmul.f32 0.015625, %v25_v2 }
  0x93   :  { %v28_v4 = vsub.f32 %v19_v0, %v27_v3 }
  0x95   :  { %v29_v5 = vmul.f32 %v28_v4, %v28_v4 }
  0x97   :  { %v30_v6 = vsel %vm22_vm0, %v29_v5, 0.0 }
  0x98   :  { %31 = vadd.xlane.f32.xlu0 %v30_v6 }
 0x125   :  { %v32_v12 = vpop.xlane.xlu0 %31 }
 0x126   :  { %v33_v13 = vmul.f32 0.015625, %v32_v12 }
 0x128   :  { %v34_v14 = vadd.f32 1e-05, %v33_v13 }
 0x12a   :  { %187 = vrsqrt.f32 %v34_v14 }
 0x134   :  { %v188_v15 = vpop.eup %187 }
 0x135   :  { %v36_v17 = vmul.f32 %v188_v15, %v28_v4 }
 0x137   :  { %v43_v19 = vmul.f32 %v156_v16, %v36_v17 }
 0x139   :  { %v50_v20 = vadd.f32 %v157_v18, %v43_v19 }
 0x13b   :  { %v51_v21 = vpack.c.bf16 %v50_v20, %v50_v20 }
 0x13d   :  { %177 = vmatmul.mubr.msk.bf16.vlgmr.msra.gmra.mrb[0].mxu0 %vm84_vm2, %v51_v21 }
 0x210   :  { %v122_v22 = vpop.f32.mrb[0].mxu0 }
 0x211   :  { %v178_v23 = vpop.f32.mrb[1].mxu0  ;;  %v129_v24 = vsel %vm128_vm3, %v122_v22, -inf }
 0x212   :  { %130 = vmax.xlane.f32.xlu1 %v129_v24  ;;  %v125_v25 = vpop.f32.mrb[2].mxu0 }
 0x213   :  { %v179_v26 = vpop.f32.mrb[3].mxu0 }
 0x29f   :  { %v131_v27 = vpop.xlane.xlu1 %130 }
 0x2a0   :  { %v132_v28 = vsub.f32 %v122_v22, %v131_v27 }
 0x2a2   :  { %v133_v29 = vmul.f32 1.442695, %v132_v28 }
 0x2a4   :  { %189 = vpow2.f32 %v133_v29 }
 0x2ae   :  { %v190_v30 = vpop.eup %189 }
 0x2af   :  { %v135_v31 = vsel %vm128_vm3, %v190_v30, 0.0 }
 0x2b0   :  { %136 = vadd.xlane.f32.xlu1 %v135_v31 }
 0x33d   :  { %v137_v32 = vpop.xlane.xlu1 %136 }
 0x33e   :  { %191 = vlog2.f32 %v137_v32 }
 0x348   :  { %v192_v33 = vpop.eup %191 }
 0x349   :  { %v139_v34 = vmul.f32 0.6931472, %v192_v33 }
 0x34b   :  { %v140_v35 = vsub.f32 %v132_v28, %v139_v34 }
 0x34d   :  { %141 = vst.msk [vmem:[#allocation2] sm:$0x3] %vm128_vm3, %v140_v35 }
 0x34e   :  { %204 = shalt.err (!%p201_p4)
}
 0x34f   :  { %s205_s30 = scalar_lea.hbm %s285_s4, 32 }
 0x350   :  { %p206_p5 = scmp.ne.s32.totalorder %s285_s4, %s205_s30  ;;  %p209_p6 = scmp.lt.u32.totalorder %s205_s30, %s285_s4 }
 0x352   :  { %p211_p7 = pnand %p209_p6, %p206_p5 }
 0x354   :  { %214 = shalt.err (!%p211_p7)
}
 0x355   :  { %151 = dma.vmem_to_hbm [thread:$0]  %s149_s2, 32, %s285_s4, [#allocation3]  }
 0x356   :  { %215 = dma.done.wait [#allocation3], 32  }
 0x357   :  { %216 = vsyncadd [#allocation3], 4294967264 }
 0x358   :  { %155 = vsyncpa [#allocation3], 1 }

// kernel: transformer_forward.5
= control target key start
LH: loop header
LB: loop body
LE: loop exit
PB: predicated region body
PF: predicated region fallthrough
CT: control target
= control target key end

     0   :  { %s2078_s25 = smov 0   ;;  %s2306_s0 = inlined_call_operand.vmem [shape: f32[2,8,64], index: 0, kind: input, shape index: {}]   ;;  %s2307_s1 = inlined_call_operand.vmem [shape: bf16[64,192], index: 1, kind: input, shape index: {}]   ;;  %s2308_s2 = inlined_call_operand.vmem [shape: f32[1,192], index: 2, kind: input, shape index: {}]   ;;  %s2309_s3 = inlined_call_operand.vmem [shape: bf16[64,64], index: 3, kind: input, shape index: {}]   ;;  %s2310_s4 = inlined_call_operand.vmem [shape: f32[1,64], index: 4, kind: input, shape index: {}]   ;;  %s2311_s5 = inlined_call_operand.vmem [shape: f32[1,64], index: 5, kind: input, shape index: {}]   ;;  %s2312_s6 = inlined_call_operand.vmem [shape: f32[1,64], index: 6, kind: input, shape index: {}]   ;;  %s2313_s7 = inlined_call_operand.vmem [shape: bf16[64,128], index: 7, kind: input, shape index: {}]   ;;  %s2314_s8 = inlined_call_operand.vmem [shape: f32[1,128], index: 8, kind: input, shape index: {}]   ;;  %s2315_s9 = inlined_call_operand.vmem [shape: bf16[128,64], index: 9, kind: input, shape index: {}]   ;;  %s2316_s10 = inlined_call_operand.vmem [shape: f32[1,64], index: 10, kind: input, shape index: {}]   ;;  %s2317_s11 = inlined_call_operand.vmem [shape: f32[1,64], index: 11, kind: input, shape index: {}]   ;;  %s2318_s12 = inlined_call_operand.vmem [shape: f32[1,64], index: 12, kind: input, shape index: {}]   ;;  %s2319_s13 = inlined_call_operand.vmem [shape: f32[2,8,64], index: 13, kind: output, shape index: {}]  }
   0x1 LB: > { %s1732_s26 = sadd.s32 4294967295, %s1996_s25   ;;  %p1736_p0 = scmp.ge.s32.totalorder %s1996_s25, 1  ;;  %s1996_s25 = sphi %s2078_s25, %s23_s25  }
   0x2   : > { %p386_p1 = scmp.lt.s32.totalorder %s1996_s25, 3 }
   0x4   : > { %p387_p2 = pnand %p1736_p0, %p386_p1 }
   0x5   : > { %v1942_v0 = vld [vmem:[%s2307_s1 + $0x4] ss:$8 sps:$4 sm:$0xff] (!%p387_p2)   ;;  %p428_p3 = scmp.lt.s32.totalorder (!%p387_p2), %s1732_s26, 1  ;;  %v1944_v1 = vld [vmem:[%s2307_s1] ss:$8 sps:$4 sm:$0xff] (!%p387_p2)   ;;  %v1998_v2 = vmov (!%p387_p2), 0   ;;  %v449_v12 = vlaneseq (!%p387_p2) }
   0x6   : > { %390 = sbr.rel (%p387_p2) target bundleno = 3965 (0xf7d), region = 72  ;;  %535 = vmatprep.mubr.bf16.mxu0 (!%p387_p2), %v1998_v2  ;;  %503 = vmatprep.subr.bf16.mxu0 (!%p387_p2), %v1942_v0  ;;  %v1945_v3 = vld [vmem:[%s2307_s1 + $0x14] ss:$8 sps:$4 sm:$0xff] (!%p387_p2)   ;;  %v1947_v4 = vld [vmem:[%s2307_s1 + $0x10] ss:$8 sps:$4 sm:$0xff] (!%p387_p2)   ;;  %vm499_vm0 = vcmask (!%p387_p2), 523264  }
   0x7   : > { %504 = vmatpush1.bf16.msra.mxu0 (!%p387_p2), %v1944_v1  ;;  %v1948_v5 = vld [vmem:[%s2307_s1 + $0x24] ss:$8 sps:$4 sm:$0xff] (!%p387_p2)   ;;  %v1950_v6 = vld [vmem:[%s2307_s1 + $0x20] ss:$8 sps:$4 sm:$0xff] (!%p387_p2)   ;;  %v1951_v7 = vld [vmem:[%s2307_s1 + $0x34] ss:$8 sps:$4 sm:$0xff] (!%p387_p2)  }
   0x8   : > { %505 = vmatprep.subr.bf16.mxu0 (!%p387_p2), %v1945_v3  ;;  %v1953_v8 = vld [vmem:[%s2307_s1 + $0x30] ss:$8 sps:$4 sm:$0xff] (!%p387_p2)   ;;  %v1999_v11 = vmov (!%p387_p2), 0.0   ;;  %v450_v13 = vshrl.u32 (!%p387_p2), %v449_v12, 7  ;;  %vm2000_vm1 = vmmov (!%p387_p2), 0   ;;  %s2001_s17 = smov (!%p387_p2), 48  }
   0x9   : > { %1828 = vmatprep.subr.mxu1 (!%p387_p2), %v1999_v11  ;;  %1830 = vmatprep.mubr.msk.f32.mxu1 (!%p387_p2), %vm2000_vm1, %v1999_v11  ;;  %v447_v15 = vld [vmem:[%s2308_s2] sm:$0x3] (!%p387_p2)  ;;  %s2002_s18 = smov (!%p387_p2), 64   ;;  %vm555_vm2 = vcmask (!%p387_p2), 130048   ;;  %vm630_vm3 = vcmask (!%p387_p2), 64512   ;;  %s2003_s19 = smov (!%p387_p2), 112  }
   0xa   : > { %v451_v14 = vsub.s32 (!%p387_p2), 0, %v450_v13  ;;  %v455_v22 = vsub.s32 (!%p387_p2), 1, %v450_v13  ;;  %s2004_s21 = smov (!%p387_p2), 96   ;;  %s2005_s22 = smov (!%p387_p2), 32   ;;  %v1954_v55 = vld [vmem:[%s2309_s3 + $0x8] sm:$0xff] (!%p387_p2)   ;;  %v1955_v57 = vld [vmem:[%s2309_s3] sm:$0xff] (!%p387_p2)  }
   0xb   : > { %506 = vmatpush1.bf16.msra.mxu0 (!%p387_p2), %v1947_v4  ;;  %s2007_s30 = smov (!%p387_p2), 16  }
   0xc   : > { %507 = vmatprep.subr.bf16.mxu0 (!%p387_p2), %v1948_v5  ;;  %v452_v16 = vrot.slane (!%p387_p2), %v447_v15, %v451_v14  ;;  %v456_v23 = vrot.slane (!%p387_p2), %v447_v15, %v455_v22  ;;  %v1956_v22 = vld [vmem:[%s2309_s3 + $0x10] sm:$0xff] (!%p387_p2)  }
   0xd   : > { %s2321_s26 = smov (!%p428_p3, %s1732_s26), 1 }
   0xe   : > { %s1737_s20 = sshll.u32 %s2321_s26, 3 }
   0xf   : > { %s431_s29 = scalar_lea.vmem %s2306_s0, %s1737_s20  ;;  %508 = vmatpush1.bf16.msra.mxu0 %v1950_v6  ;;  %s435_s16 = scalar_lea.vmem %s2319_s13, %s1737_s20 }
  0x10   : > { %v2118_v9 = vld [vmem:[%s431_s29] sm:$0xff]  ;;  %509 = vmatprep.subr.bf16.mxu0 %v1951_v7  ;;  %s2006_s29 = smov 80  }
  0x11   : > { %v438_v10 = vpack.c.bf16 %v2118_v9, %v2118_v9 }
  0x13   : > { %510 = vmatpush1.bf16.msra.mxu0 %v1953_v8 }
  0x14   : > { %1848 = vmatprep.subr.bf16.mxu0 %v1999_v11 }
  0x16   : > { %1747 = vmatmul.mubr.msk.bf16.vlgmr.msra.gmra.mrb[0].mxu0 %vm499_vm0, %v438_v10 }
  0x17   : > { %1850 = vmatprep.mubr.msk.bf16.mxu0 %vm2000_vm1, %v1999_v11  ;;  %1849 = vmatpush3.bf16.msra.mxu0 %v1954_v55 }
  0x18   : > { %1854 = vmatprep.subr.bf16.mxu0 %v1999_v11 }
  0xe9   : > { %v537_v17 = vpop.f32.mrb[0].mxu0 }
  0xea   : > { %v2132_v18 = vadd.f32 %v537_v17, %v452_v16  ;;  %v539_v19 = vpop.f32.mrb[1].mxu0 }
  0xeb   : > { %v541_v20 = vpop.f32.mrb[2].mxu0  ;;  %v2138_v25 = vadd.f32 %v539_v19, %v456_v23 }
  0xec   : > { %v542_v21 = vpop.f32.mrb[3].mxu0  ;;  %718 = vrot.lane.b32.xlu1 %v2132_v18, %s2001_s17  ;;  %553 = vrot.lane.b32.xlu0 %v2132_v18, %s2002_s18 }
 0x15e   : > { %v554_v24 = vpop.permute.xlu0 %553  ;;  %v719_v34 = vpop.permute.xlu1 %718 }
 0x15f   : > { %1829 = vmatpush3.xpose.msk.msra.mxu1 %vm555_vm2, %v554_v24 }
 0x160   : > { %1833 = vmatprep.subr.mxu1 %v1999_v11 }
 0x162   : > { %1831 = vmatmul.mubr.msk.f32.vlgmr.msra.gmra.mrb[0].mxu1 %vm555_vm2, %v2132_v18 }
 0x163   : > { %1834 = vmatpush3.msra.mxu1 %v2138_v25  ;;  %1835 = vmatprep.mubr.msk.f32.mxu1 %vm2000_vm1, %v1999_v11 }
 0x164   : > { %1838 = vmatprep.subr.mxu1 %v1999_v11 }
 0x235   : > { %v626_v26 = vpop.f32.mrb[0].mxu1 }
 0x236   : > { %v1832_v27 = vpop.f32.mrb[1].mxu1  ;;  %v631_v28 = vsel %vm630_vm3, %v626_v26, -inf }
 0x237   : > { %632 = vmax.xlane.f32.xlu0 %v631_v28 }
 0x24d   : > { %806 = vrot.lane.b32.xlu0 %v2138_v25, %s2003_s19 }
 0x2c4   : > { %v633_v29 = vpop.xlane.xlu0 %632 }
 0x2c5   : > { %v634_v30 = vsub.f32 %v626_v26, %v633_v29 }
 0x2c7   : > { %v635_v31 = vmul.f32 1.442695, %v634_v30 }
 0x2c8   : > { %v807_v39 = vpop.permute.xlu0 %806 }
 0x2c9   : > { %1970 = vpow2.f32 %v635_v31 }
 0x2d3   : > { %v1971_v32 = vpop.eup %1970 }
 0x2d4   : > { %v637_v33 = vsel %vm630_vm3, %v1971_v32, 0.0 }
 0x2d5   : > { %638 = vadd.xlane.f32.xlu1 %v637_v33 }
 0x2e6   : > { %716 = vrot.lane.b32.xlu1 %v2132_v18, %s2003_s19 }
 0x362   : > { %v639_v35 = vpop.xlane.xlu1 %638 }
 0x363   : > { %1972 = vrcp.f32 %v639_v35 }
 0x366   : > { %v717_v38 = vpop.permute.xlu1 %716 }
 0x36d   : > { %v1973_v36 = vpop.eup %1972 }
 0x36e   : > { %v641_v37 = vmul.f32 %v1973_v36, %v1971_v32  ;;  %v1957_v36 = vld [vmem:[%s2309_s3 + $0x18] sm:$0xff]  }
 0x370   : > { %1836 = vmatmul.mubr.msk.f32.vlgmr.msra.gmra.mrb[2].mxu1 %vm630_vm3, %v641_v37 }
 0x371   : > { %1839 = vmatpush3.xpose.msk.msra.mxu1 %vm555_vm2, %v719_v34  ;;  %1840 = vmatprep.mubr.msk.f32.mxu1 %vm2000_vm1, %v1999_v11 }
 0x372   : > { %1843 = vmatprep.subr.mxu1 %v1999_v11 }
 0x374   : > { %1841 = vmatmul.mubr.msk.f32.vlgmr.msra.gmra.mrb[4].mxu1 %vm555_vm2, %v717_v38 }
 0x375   : > { %1844 = vmatpush3.msra.mxu1 %v807_v39  ;;  %1845 = vmatprep.mubr.msk.f32.mxu1 %vm2000_vm1, %v1999_v11 }
 0x376   : > { %1860 = vmatprep.subr.mxu1 %v1999_v11 }
 0x443   : > { %v711_v40 = vpop.f32.mrb[2].mxu1 }
 0x444   : > { %v1837_v41 = vpop.f32.mrb[3].mxu1  ;;  %v715_v63 = vpack.c.bf16 %v711_v40, %v711_v40 }
 0x447   : > { %v790_v42 = vpop.f32.mrb[4].mxu1 }
 0x448   : > { %v1842_v43 = vpop.f32.mrb[5].mxu1  ;;  %v794_v44 = vsel %vm630_vm3, %v790_v42, -inf }
 0x449   : > { %795 = vmax.xlane.f32.xlu1 %v794_v44 }
 0x45a   : > { %981 = vrot.lane.b32.xlu1 %v2132_v18, %s2004_s21 }
 0x4d6   : > { %v796_v45 = vpop.xlane.xlu1 %795 }
 0x4d7   : > { %v797_v46 = vsub.f32 %v790_v42, %v796_v45 }
 0x4d9   : > { %v798_v47 = vmul.f32 1.442695, %v797_v46 }
 0x4da   : > { %v982_v54 = vpop.permute.xlu1 %981 }
 0x4db   : > { %1974 = vpow2.f32 %v798_v47 }
 0x4e5   : > { %v1975_v48 = vpop.eup %1974 }
 0x4e6   : > { %v800_v49 = vsel %vm630_vm3, %v1975_v48, 0.0 }
 0x4e7   : > { %801 = vadd.xlane.f32.xlu0 %v800_v49 }
 0x4fd   : > { %983 = vrot.lane.b32.xlu0 %v2132_v18, %s2005_s22 }
 0x574   : > { %v802_v50 = vpop.xlane.xlu0 %801 }
 0x575   : > { %1976 = vrcp.f32 %v802_v50 }
 0x578   : > { %v984_v53 = vpop.permute.xlu0 %983 }
 0x57f   : > { %v1977_v51 = vpop.eup %1976 }
 0x580   : > { %v804_v52 = vmul.f32 %v1977_v51, %v1975_v48  ;;  %v1768_v48 = vld [vmem:[%s2310_s4] ss:$0 sm:$0xff] }
 0x582   : > { %1846 = vmatmul.mubr.msk.f32.vlgmr.msra.gmra.mrb[6].mxu1 %vm630_vm3, %v804_v52 }
 0x583   : > { %1861 = vmatpush3.xpose.msk.msra.mxu1 %vm555_vm2, %v984_v53  ;;  %1862 = vmatprep.mubr.msk.f32.mxu1 %vm2000_vm1, %v1999_v11 }
 0x584   : > { %1870 = vmatprep.subr.bf16.mxu1 %v1999_v11 }
 0x586   : > { %1863 = vmatmul.mubr.msk.f32.vlgmr.msra.gmra.mrb[8].mxu1 %vm555_vm2, %v982_v54 }
 0x587   : > { %1872 = vmatprep.mubr.msk.bf16.mxu1 %vm2000_vm1, %v1999_v11  ;;  %1871 = vmatpush3.bf16.msra.mxu1 %v1956_v22 }
 0x588   : > { %1886 = vmatprep.subr.bf16.mxu1 %v1999_v11 }
 0x655   : > { %v878_v56 = vpop.f32.mrb[6].mxu1 }
 0x656   : > { %v882_v58 = vpack.c.bf16 %v878_v56, %v878_v56  ;;  %v1847_v59 = vpop.f32.mrb[7].mxu1 }
 0x658   : > { %1851 = vmatmul.mubr.msk.bf16.vlgmr.msra.gmra.mrb[4].mxu0 %vm555_vm2, %v882_v58 }
 0x659   : > { %v1055_v60 = vpop.f32.mrb[8].mxu1  ;;  %1855 = vmatpush3.bf16.msra.mxu0 %v1955_v57  ;;  %1856 = vmatprep.mubr.msk.bf16.mxu0 %vm2000_vm1, %v1999_v11 }
 0x65a   : > { %v1864_v61 = vpop.f32.mrb[9].mxu1  ;;  %v1059_v62 = vsel %vm630_vm3, %v1055_v60, -inf  ;;  %1865 = vmatprep.subr.mxu0 %v1999_v11 }
 0x65b   : > { %1060 = vmax.xlane.f32.xlu0 %v1059_v62  ;;  %v1958_v61 = vld [vmem:[%s2313_s7] sm:$0xff]   ;;  %v1960_v62 = vld [vmem:[%s2313_s7 + $0x10] sm:$0xff]  }
 0x660   : > { %1857 = vmatmul.mubr.msk.bf16.vlgmr.msra.gmra.mrb[8].mxu0 %vm555_vm2, %v715_v63  ;;  %v1961_v63 = vld [vmem:[%s2313_s7 + $0x18] sm:$0xff]  }
 0x661   : > { %1867 = vmatprep.mubr.msk.f32.mxu0 %vm2000_vm1, %v1999_v11 }
 0x671   : > { %1070 = vrot.lane.b32.xlu0 %v2138_v25, %s2004_s21 }
 0x675   : > { %1197 = vrot.lane.b32.xlu0 %v2132_v18, %s2006_s29 }
 0x6e8   : > { %v1061_v0 = vpop.xlane.xlu0 %1060 }
 0x6e9   : > { %v1062_v1 = vsub.f32 %v1055_v60, %v1061_v0  ;;  %v1962_v0 = vld [vmem:[%s2315_s9] sm:$0xff]  }
 0x6eb   : > { %v1063_v2 = vmul.f32 1.442695, %v1062_v1  ;;  %v1963_v1 = vld [vmem:[%s2315_s9 + $0x8] sm:$0xff]  }
 0x6ec   : > { %v1071_v3 = vpop.permute.xlu0 %1070 }
 0x6ed   : > { %1978 = vpow2.f32 %v1063_v2  ;;  %1866 = vmatpush3.msra.mxu0 %v1071_v3  ;;  %v1964_v2 = vld [vmem:[%s2315_s9 + $0x10] sm:$0xff]   ;;  %v1965_v3 = vld [vmem:[%s2315_s9 + $0x18] sm:$0xff]  }
 0x6ee   : > { %1876 = vmatprep.subr.mxu0 %v1999_v11 }
 0x6f7   : > { %v1979_v4 = vpop.eup %1978 }
 0x6f8   : > { %v1065_v5 = vsel %vm630_vm3, %v1979_v4, 0.0 }
 0x6f9   : > { %1066 = vadd.xlane.f32.xlu1 %v1065_v5  ;;  %v1967_v5 = vld [vmem:[%s2315_s9 + $0x28] sm:$0xff]  }
 0x70a   : > { %1199 = vrot.lane.b32.xlu1 %v2132_v18, %s2007_s30  ;;  %v1198_v18 = vpop.permute.xlu0 %1197 }
 0x72b   : > { %v926_v6 = vpop.f32.mrb[4].mxu0 }
 0x72c   : > { %v1852_v7 = vpop.f32.mrb[5].mxu0 }
 0x72d   : > { %v929_v8 = vpop.f32.mrb[6].mxu0 }
 0x72e   : > { %v1853_v10 = vpop.f32.mrb[7].mxu0 }
 0x733   : > { %v975_v12 = vpop.f32.mrb[8].mxu0 }
 0x734   : > { %v976_v13 = vadd.f32 %v975_v12, %v926_v6  ;;  %v1858_v14 = vpop.f32.mrb[9].mxu0  ;;  %v1769_v12 = vld [vmem:[%s2311_s5] ss:$0 sm:$0xff] }
 0x735   : > { %v978_v15 = vpop.f32.mrb[10].mxu0  ;;  %v1770_v14 = vld [vmem:[%s2312_s6] ss:$0 sm:$0xff] }
 0x736   : > { %v1859_v16 = vpop.f32.mrb[11].mxu0 }
 0x786   : > { %v1067_v17 = vpop.xlane.xlu1 %1066 }
 0x787   : > { %1980 = vrcp.f32 %v1067_v17 }
 0x78a   : > { %v1200_v21 = vpop.permute.xlu1 %1199 }
 0x791   : > { %v1981_v19 = vpop.eup %1980 }
 0x792   : > { %v1069_v20 = vmul.f32 %v1981_v19, %v1979_v4  ;;  %v1966_v4 = vld [vmem:[%s2315_s9 + $0x20] sm:$0xff]   ;;  %v1968_v19 = vld [vmem:[%s2315_s9 + $0x30] sm:$0xff]  }
 0x794   : > { %1868 = vmatmul.mubr.msk.f32.vlgmr.msra.gmra.mrb[12].mxu0 %vm630_vm3, %v1069_v20  ;;  %v1969_v20 = vld [vmem:[%s2315_s9 + $0x38] sm:$0xff]  }
 0x795   : > { %1877 = vmatpush3.xpose.msk.msra.mxu0 %vm555_vm2, %v1200_v21  ;;  %1878 = vmatprep.mubr.msk.f32.mxu0 %vm2000_vm1, %v1999_v11  ;;  %v1771_v21 = vld [vmem:[%s2314_s8] ss:$0 sm:$0xff] }
 0x796   : > { %1881 = vmatprep.subr.mxu0 %v1999_v11 }
 0x798   : > { %1879 = vmatmul.mubr.msk.f32.vlgmr.msra.gmra.mrb[14].mxu0 %vm555_vm2, %v1198_v18 }
 0x799   : > { %1883 = vmatprep.mubr.msk.f32.mxu0 %vm2000_vm1, %v1999_v11 }
 0x867   : > { %v1142_v23 = vpop.f32.mrb[12].mxu0 }
 0x868   : > { %v1146_v24 = vpack.c.bf16 %v1142_v23, %v1142_v23  ;;  %v1869_v26 = vpop.f32.mrb[13].mxu0 }
 0x86a   : > { %1873 = vmatmul.mubr.msk.bf16.vlgmr.msra.gmra.mrb[12].mxu1 %vm555_vm2, %v1146_v24 }
 0x86b   : > { %v1271_v27 = vpop.f32.mrb[14].mxu0  ;;  %1888 = vmatprep.mubr.msk.bf16.mxu1 %vm2000_vm1, %v1999_v11  ;;  %1887 = vmatpush3.bf16.msra.mxu1 %v1957_v36 }
 0x86c   : > { %v1880_v28 = vpop.f32.mrb[15].mxu0  ;;  %v1275_v29 = vsel %vm630_vm3, %v1271_v27, -inf  ;;  %1904 = vmatprep.subr.bf16.mxu1 %v1999_v11 }
 0x86d   : > { %1276 = vmax.xlane.f32.xlu0 %v1275_v29 }
 0x883   : > { %1286 = vrot.lane.b32.xlu0 %v2138_v25, %s2006_s29 }
 0x8fa   : > { %v1277_v30 = vpop.xlane.xlu0 %1276 }
 0x8fb   : > { %v1278_v31 = vsub.f32 %v1271_v27, %v1277_v30 }
 0x8fd   : > { %v1279_v32 = vmul.f32 1.442695, %v1278_v31 }
 0x8fe   : > { %v1287_v33 = vpop.permute.xlu0 %1286 }
 0x8ff   : > { %1982 = vpow2.f32 %v1279_v32  ;;  %1882 = vmatpush3.msra.mxu0 %v1287_v33 }
 0x900   : > { %1892 = vmatprep.subr.bf16.mxu0 %v1999_v11 }
 0x909   : > { %v1983_v34 = vpop.eup %1982 }
 0x90a   : > { %v1281_v35 = vsel %vm630_vm3, %v1983_v34, 0.0 }
 0x90b   : > { %1282 = vadd.xlane.f32.xlu1 %v1281_v35 }
 0x93d   : > { %v1190_v25 = vpop.f32.mrb[12].mxu1 }
 0x93e   : > { %v1196_v37 = vadd.f32 %v1190_v25, %v976_v13  ;;  %v1874_v38 = vpop.f32.mrb[13].mxu1 }
 0x93f   : > { %v1193_v39 = vpop.f32.mrb[14].mxu1 }
 0x940   : > { %v1875_v40 = vpop.f32.mrb[15].mxu1 }
 0x998   : > { %v1283_v41 = vpop.xlane.xlu1 %1282 }
 0x999   : > { %1984 = vrcp.f32 %v1283_v41 }
 0x9a3   : > { %v1985_v42 = vpop.eup %1984 }
 0x9a4   : > { %v1285_v43 = vmul.f32 %v1985_v42, %v1983_v34 }
 0x9a6   : > { %1884 = vmatmul.mubr.msk.f32.vlgmr.msra.gmra.mrb[16].mxu0 %vm630_vm3, %v1285_v43 }
 0x9a7   : > { %1900 = vmatprep.mubr.msk.bf16.mxu0 %vm2000_vm1, %v1999_v11  ;;  %1893 = vmatpush3.bf16.msra.mxu0 %v1958_v61 }
 0x9a8   : > { %1894 = vmatprep.subr.bf16.mxu0 %v1999_v11 }
 0xa79   : > { %v1358_v44 = vpop.f32.mrb[16].mxu0 }
 0xa7a   : > { %v1362_v45 = vpack.c.bf16 %v1358_v44, %v1358_v44  ;;  %v1885_v46 = vpop.f32.mrb[17].mxu0  ;;  %v1786_v44 = vld [vmem:[%s2317_s11] ss:$0 sm:$0xff] }
 0xa7b   : > { %v1787_v46 = vld [vmem:[%s2318_s12] ss:$0 sm:$0xff] }
 0xa7c   : > { %1889 = vmatmul.mubr.msk.bf16.vlgmr.msra.gmra.mrb[16].mxu1 %vm555_vm2, %v1362_v45 }
 0xa7d   : > { %1920 = vmatprep.mubr.msk.bf16.mxu1 %vm2000_vm1, %v1999_v11  ;;  %1905 = vmatpush3.bf16.msra.mxu1 %v1962_v0 }
 0xa7e   : > { %1906 = vmatprep.subr.bf16.mxu1 %v1999_v11 }
 0xa81   : > { %1907 = vmatpush3.bf16.msra.mxu1 %v1963_v1 }
 0xa82   : > { %1908 = vmatprep.subr.bf16.mxu1 %v1999_v11 }
 0xa85   : > { %1909 = vmatpush3.bf16.msra.mxu1 %v1964_v2 }
 0xa86   : > { %1910 = vmatprep.subr.bf16.mxu1 %v1999_v11 }
 0xa89   : > { %1911 = vmatpush3.bf16.msra.mxu1 %v1965_v3 }
 0xa8a   : > { %1912 = vmatprep.subr.bf16.mxu1 %v1999_v11 }
 0xa8d   : > { %1913 = vmatpush3.bf16.msra.mxu1 %v1966_v4 }
 0xa8e   : > { %1914 = vmatprep.subr.bf16.mxu1 %v1999_v11 }
 0xa91   : > { %1915 = vmatpush3.bf16.msra.mxu1 %v1967_v5 }
 0xa92   : > { %1916 = vmatprep.subr.bf16.mxu1 %v1999_v11 }
 0xa95   : > { %1917 = vmatpush3.bf16.msra.mxu1 %v1968_v19 }
 0xa96   : > { %1918 = vmatprep.subr.bf16.mxu1 %v1999_v11 }
 0xa99   : > { %1919 = vmatpush3.bf16.msra.mxu1 %v1969_v20 }
 0xb4f   : > { %v1406_v47 = vpop.f32.mrb[16].mxu1 }
 0xb50   : > { %v1412_v49 = vadd.f32 %v1406_v47, %v1196_v37  ;;  %v1890_v50 = vpop.f32.mrb[17].mxu1 }
 0xb51   : > { %v1409_v51 = vpop.f32.mrb[18].mxu1 }
 0xb52   : > { %v1420_v52 = vadd.f32 %v1768_v48, %v1412_v49  ;;  %v1891_v53 = vpop.f32.mrb[19].mxu1 }
 0xb54   : > { %v1421_v54 = vadd.f32 %v1420_v52, %v2118_v9  ;;  %v1959_v9 = vld [vmem:[%s2313_s7 + $0x8] sm:$0xff]  }
 0xb55   : > { %1895 = vmatpush3.bf16.msra.mxu0 %v1959_v9 }
 0xb56   : > { %v1424_v55 = vsel %vm499_vm0, %v1421_v54, 0.0  ;;  %1896 = vmatprep.subr.bf16.mxu0 %v1999_v11 }
 0xb57   : > { %1425 = vadd.xlane.f32.xlu1 %v1424_v55 }
 0xb59   : > { %1897 = vmatpush3.bf16.msra.mxu0 %v1960_v62 }
 0xb5a   : > { %1898 = vmatprep.subr.bf16.mxu0 %v1999_v11  ;;  %v1777_v11 = vld [vmem:[%s2316_s10] ss:$0 sm:$0xff] }
 0xb5d   : > { %1899 = vmatpush3.bf16.msra.mxu0 %v1961_v63 }
 0xbe4   : > { %v1426_v56 = vpop.xlane.xlu1 %1425 }
 0xbe5   : > { %v1428_v57 = vmul.f32 0.015625, %v1426_v56 }
 0xbe7   : > { %v1429_v58 = vsub.f32 %v1421_v54, %v1428_v57 }
 0xbe9   : > { %v1430_v59 = vmul.f32 %v1429_v58, %v1429_v58 }
 0xbeb   : > { %v1431_v60 = vsel %vm499_vm0, %v1430_v59, 0.0 }
 0xbec   : > { %1432 = vadd.xlane.f32.xlu1 %v1431_v60 }
 0xc79   : > { %v1433_v6 = vpop.xlane.xlu1 %1432 }
 0xc7a   : > { %v1434_v7 = vmul.f32 0.015625, %v1433_v6 }
 0xc7c   : > { %v1435_v8 = vadd.f32 1e-05, %v1434_v7 }
 0xc7e   : > { %1986 = vrsqrt.f32 %v1435_v8 }
 0xc88   : > { %v1987_v10 = vpop.eup %1986 }
 0xc89   : > { %v1437_v13 = vmul.f32 %v1987_v10, %v1429_v58 }
 0xc8b   : > { %v1444_v15 = vmul.f32 %v1769_v12, %v1437_v13 }
 0xc8d   : > { %v1451_v16 = vadd.f32 %v1770_v14, %v1444_v15 }
 0xc8f   : > { %v1452_v17 = vpack.c.bf16 %v1451_v16, %v1451_v16 }
 0xc91   : > { %1901 = vmatmul.mubr.msk.bf16.vlgmr.msra.gmra.mrb[20].mxu0 %vm499_vm0, %v1452_v17 }
 0xd64   : > { %v1529_v18 = vpop.f32.mrb[20].mxu0 }
 0xd65   : > { %v1530_v22 = vadd.f32 %v1771_v21, %v1529_v18  ;;  %v1902_v23 = vpop.f32.mrb[21].mxu0 }
 0xd66   : > { %v1532_v24 = vpop.f32.mrb[22].mxu0 }
 0xd67   : > { %v1535_v26 = vmax.f32 %v1530_v22, 0.0  ;;  %v1903_v27 = vpop.f32.mrb[23].mxu0 }
 0xd69   : > { %v1536_v28 = vpack.c.bf16 %v1535_v26, %v1535_v26 }
 0xd6b   : > { %1921 = vmatmul.mubr.bf16.vlgmr.msra.gmra.mrb[20].mxu1 %v1536_v28 }
 0xe3e   : > { %v1642_v29 = vpop.f32.mrb[20].mxu1 }
 0xe3f   : > { %v1643_v30 = vadd.f32 %v1777_v11, %v1642_v29  ;;  %v1922_v31 = vpop.f32.mrb[21].mxu1 }
 0xe40   : > { %v1645_v32 = vpop.f32.mrb[22].mxu1 }
 0xe41   : > { %v1923_v33 = vpop.f32.mrb[23].mxu1  ;;  %v1648_v34 = vadd.f32 %v1643_v30, %v1451_v16 }
 0xe43   : > { %v1651_v35 = vsel %vm499_vm0, %v1648_v34, 0.0 }
 0xe44   : > { %1652 = vadd.xlane.f32.xlu0 %v1651_v35 }
 0xed1   : > { %v1653_v36 = vpop.xlane.xlu0 %1652 }
 0xed2   : > { %v1654_v25 = vmul.f32 0.015625, %v1653_v36 }
 0xed4   : > { %v1655_v37 = vsub.f32 %v1648_v34, %v1654_v25 }
 0xed6   : > { %v1656_v38 = vmul.f32 %v1655_v37, %v1655_v37 }
 0xed8   : > { %v1657_v39 = vsel %vm499_vm0, %v1656_v38, 0.0 }
 0xed9   : > { %1658 = vadd.xlane.f32.xlu1 %v1657_v39 }
 0xf66   : > { %v1659_v40 = vpop.xlane.xlu1 %1658 }
 0xf67   : > { %v1660_v41 = vmul.f32 0.015625, %v1659_v40 }
 0xf69   : > { %v1661_v42 = vadd.f32 1e-05, %v1660_v41 }
 0xf6b   : > { %1988 = vrsqrt.f32 %v1661_v42 }
 0xf75   : > { %v1989_v43 = vpop.eup %1988 }
 0xf76   : > { %v1663_v45 = vmul.f32 %v1989_v43, %v1655_v37 }
 0xf78   : > { %v1670_v47 = vmul.f32 %v1786_v44, %v1663_v45 }
 0xf7a   : > { %v1677_v48 = vadd.f32 %v1787_v46, %v1670_v47 }
 0xf7c   : > { %1678 = vst.msk [vmem:[%s435_s16] sm:$0xff] %vm499_vm0, %v1677_v48 }
 0xf7d PF: > { %s23_s25 = sadd.s32 1, %s1996_s25  }
 0xf7e   : > { %p20_p4 = scmp.ge.s32.totalorder %s23_s25, 4  }
 0xf80   :  { %22 = sbr.rel (!%p20_p4) target bundleno = 1 (0x1), region = 102 }

</bundles_post_ra>
